<compile_context>
chip_gen: v6e
topology: v6e:2x2x1
jax: 0.10.0
libtpu: 0.0.40
codegen_flags: <defaults>
</compile_context>

<pallas_src>
import functools
import math

import jax
import jax.numpy as jnp
from jax import lax
from jax.experimental import pallas as pl
from jax.experimental.pallas import tpu as pltpu


# ---------------------------------------------------------------------------
# small helpers
# ---------------------------------------------------------------------------

def _pick_tile(m, max_tile=512):
    """Largest tile (multiple of 8, <= max_tile) dividing m; fall back to full extent."""
    for c in (512, 256, 128, 64, 32, 16, 8):
        if c <= max_tile and m % c == 0:
            return c
    return m


_VMEM_LIMIT_BYTES = None


def _vmem_limit():
    """~3/4 of physical VMEM, capped at 100 MiB (96 MiB on v5e/v6e, 48 MiB on v7x)."""
    global _VMEM_LIMIT_BYTES
    if _VMEM_LIMIT_BYTES is None:
        limit = 64 * 1024 * 1024
        try:
            cap = pltpu.get_tpu_info().vmem_capacity_bytes
            limit = int(min(cap * 3 // 4, 100 * 1024 * 1024))
        except Exception:
            pass
        _VMEM_LIMIT_BYTES = limit
    return _VMEM_LIMIT_BYTES


_BUFFERED1_OK = False


def _probe_buffered1():
    """Feature-detect single-buffering of constant blocks (pipeline_mode=pl.Buffered(1))."""
    global _BUFFERED1_OK
    try:
        def _k(a_ref, o_ref):
            o_ref[...] = a_ref[...]
        out = pl.pallas_call(
            _k,
            out_shape=jax.ShapeDtypeStruct((8, 128), jnp.float32),
            grid=(1,),
            in_specs=[pl.BlockSpec((8, 128), lambda i: (0, 0), pipeline_mode=pl.Buffered(1))],
            out_specs=pl.BlockSpec((8, 128), lambda i: (0, 0)),
        )(jnp.zeros((8, 128), jnp.float32))
        jax.block_until_ready(out)
        _BUFFERED1_OK = True
    except Exception:
        _BUFFERED1_OK = False


def _const_spec(shape, index_map):
    """BlockSpec for a block whose index never changes; single-buffer when supported."""
    if _BUFFERED1_OK:
        return pl.BlockSpec(shape, index_map, pipeline_mode=pl.Buffered(1))
    return pl.BlockSpec(shape, index_map)


# ---------------------------------------------------------------------------
# Pallas kernels
# ---------------------------------------------------------------------------

def _layernorm_kernel(x_ref, g_ref, b_ref, o_ref):
    # nn.LayerNorm over last dim, eps=1e-5, biased variance (f32 math).
    x = x_ref[...]
    mu = jnp.mean(x, axis=-1, keepdims=True)
    xc = x - mu
    var = jnp.mean(xc * xc, axis=-1, keepdims=True)
    o_ref[...] = (xc * lax.rsqrt(var + 1e-5) * g_ref[...] + b_ref[...]).astype(o_ref.dtype)


def _vec_attn_kernel(mask_ref, bias_ref, q_ref, o_ref, *, scale):
    # One (batch, head) step of SDPA with q=k=v=ln_vec(vec) in head-major (n, 3*hd) layout.
    q = q_ref[0, 0]                                                   # (n, 3*hd) bf16
    qs = (q.astype(jnp.float32) * scale).astype(jnp.bfloat16)         # fold 1/sqrt(3*hd) into q
    dn = (((1,), (1,)), ((), ()))
    s = lax.dot_general(qs, q, dn, preferred_element_type=jnp.float32)  # (n, n) = q @ k^T * scale
    neg = mask_ref[0] * jnp.float32(-1e30)                            # (1, n): padded key columns
    s = s + bias_ref[0, 0] + neg
    m = jnp.max(s, axis=-1, keepdims=True)
    p = jnp.exp(s - m)
    inv = pl.reciprocal(jnp.sum(p, axis=-1, keepdims=True), approx=True)
    pv = jnp.dot(p.astype(jnp.bfloat16), q, preferred_element_type=jnp.float32)  # (n, 3*hd)
    o_ref[0, 0] = (pv * inv).astype(o_ref.dtype)                      # lane-dense full-block store


def _attn_epilogue_kernel(x_ref, xg_ref, xb_ref, attn_ref, vres_ref, wo_ref, wada_ref,
                          x_out_ref, vec_out_ref):
    # Fused: out_proj -> vec residual; adaLN_vec (SiLU -> one (E,2E) matmul) -> 2-norm over the
    # 3 spatial components -> modulate LN(x) -> x residual.
    _, _, tn, E = vres_ref.shape
    a = attn_ref[0].reshape(3 * tn, E)                                 # bf16 attention output
    proj = jnp.dot(a, wo_ref[...], preferred_element_type=jnp.float32)  # out_proj (3*tn, E)
    vres = vres_ref[0].reshape(3 * tn, E)
    vec_out_ref[0] = (proj + vres).reshape(3, tn, E)                   # vec residual stream (f32)

    act = proj * jax.nn.sigmoid(proj)                                  # SiLU (pre-residual, as in ref)
    st = jnp.dot(act.astype(jnp.bfloat16), wada_ref[...],
                 preferred_element_type=jnp.float32)                   # (3*tn, 2E) scale|shift
    ss = jnp.sum(st.reshape(3, tn, 2 * E) ** 2, axis=0)                # (tn, 2E)
    scale = jnp.sqrt(ss[:, :E])
    shift = jnp.sqrt(ss[:, E:])

    x = x_ref[0]
    mu = jnp.mean(x, axis=-1, keepdims=True)
    xc = x - mu
    var = jnp.mean(xc * xc, axis=-1, keepdims=True)
    xln = xc * lax.rsqrt(var + 1e-5) * xg_ref[...] + xb_ref[...]
    x_out_ref[0] = xln * scale + shift + x


def _mlp_epilogue_kernel(x_ref, xg_ref, xb_ref, vec_ref, vg_ref, vb_ref,
                         w1_ref, w2_ref, wada_ref, x_out_ref, vec_out_ref):
    # Fused: vec_mlp_norm -> Linear(E,F) -> SiLU -> Linear(F,E) -> vec residual;
    # adaLN_vec_mlp -> 2-norm over 3 components -> modulate x_mlp_norm(x) -> x residual.
    _, _, tn, E = vec_ref.shape
    v = vec_ref[0].reshape(3 * tn, E)
    mu = jnp.mean(v, axis=-1, keepdims=True)
    vc = v - mu
    var = jnp.mean(vc * vc, axis=-1, keepdims=True)
    vln = vc * lax.rsqrt(var + 1e-5) * vg_ref[...] + vb_ref[...]

    h1 = jnp.dot(vln.astype(jnp.bfloat16), w1_ref[...], preferred_element_type=jnp.float32)
    h1 = h1 * jax.nn.sigmoid(h1)
    mlp = jnp.dot(h1.astype(jnp.bfloat16), w2_ref[...], preferred_element_type=jnp.float32)
    vec_out_ref[0] = (mlp + v).reshape(3, tn, E)

    act = mlp * jax.nn.sigmoid(mlp)
    st = jnp.dot(act.astype(jnp.bfloat16), wada_ref[...], preferred_element_type=jnp.float32)
    ss = jnp.sum(st.reshape(3, tn, 2 * E) ** 2, axis=0)
    scale = jnp.sqrt(ss[:, :E])
    shift = jnp.sqrt(ss[:, E:])

    x = x_ref[0]
    mu = jnp.mean(x, axis=-1, keepdims=True)
    xc = x - mu
    var = jnp.mean(xc * xc, axis=-1, keepdims=True)
    xln = xc * lax.rsqrt(var + 1e-5) * xg_ref[...] + xb_ref[...]
    x_out_ref[0] = xln * scale + shift + x


def _vec_init_kernel(pos_ref, pos_t_ref, rm_ref, cm_ref, x_ref, vec_ref):
    # Per (batch, row-tile): delta = pos[l]-pos[m]; dist masked_fill(1e6); one stacked matmul
    # vec[k, l, :] = sum_m (delta_k[l,m] / (dist[l,m]+1)) * x[m, :]
    _, _, tl, E = vec_ref.shape
    pos = pos_ref[0]                                                   # (tl, 3)
    pos_t = pos_t_ref[0]                                               # (3, n)
    d0 = pos[:, 0:1] - pos_t[0:1, :]
    d1 = pos[:, 1:2] - pos_t[1:2, :]
    d2 = pos[:, 2:3] - pos_t[2:3, :]
    dist = jnp.sqrt(d0 * d0 + d1 * d1 + d2 * d2)
    pad = jnp.maximum(rm_ref[0], cm_ref[0]) > 0.5
    dist = jnp.where(pad, jnp.float32(1e6), dist)
    inv = 1.0 / (dist + 1.0)
    dall = jnp.concatenate([d0 * inv, d1 * inv, d2 * inv], axis=0).astype(jnp.bfloat16)  # (3*tl, n)
    v = jnp.dot(dall, x_ref[0], preferred_element_type=jnp.float32)    # (3*tl, E)
    vec_ref[0] = v.reshape(3, tl, E)


# ---------------------------------------------------------------------------
# pallas_call wrappers
# ---------------------------------------------------------------------------

def pallas_layernorm(x2d, gamma, beta, out_dtype=jnp.float32, max_tile=512):
    M, E = x2d.shape
    tm = _pick_tile(M, max_tile)
    row = pl.BlockSpec((tm, E), lambda i: (i, 0))
    gspec = _const_spec((1, E), lambda i: (0, 0))
    return pl.pallas_call(
        _layernorm_kernel,
        out_shape=jax.ShapeDtypeStruct((M, E), out_dtype),
        grid=(M // tm,),
        in_specs=[row, gspec, gspec],
        out_specs=row,
        compiler_params=pltpu.CompilerParams(
            dimension_semantics=("parallel",), vmem_limit_bytes=_vmem_limit()),
    )(x2d, gamma.reshape(1, E), beta.reshape(1, E))


def pallas_vec_attention(vln_h, graph_attn_bias, mask_f):
    # vln_h: (bsz, H, n, 3*hd) bf16 (q = k = v); bias: (bsz, H, n, n) f32; mask_f: (bsz, 1, n) f32.
    bsz, H, n, D = vln_h.shape
    kern = functools.partial(_vec_attn_kernel, scale=1.0 / math.sqrt(D))
    ce = pl.CostEstimate(
        flops=int(4 * bsz * H * n * n * D),
        transcendentals=int(bsz * H * n * n),
        bytes_accessed=int(4 * bsz * H * n * n + 4 * bsz * H * n * D + 4 * bsz * n),
    )
    return pl.pallas_call(
        kern,
        out_shape=jax.ShapeDtypeStruct((bsz, H, n, D), jnp.bfloat16),
        grid=(bsz, H),
        in_specs=[
            pl.BlockSpec((1, 1, n), lambda b, h: (b, 0, 0)),        # key padding mask (float)
            pl.BlockSpec((1, 1, n, n), lambda b, h: (b, h, 0, 0)),  # graph_attn_bias, per head
            pl.BlockSpec((1, 1, n, D), lambda b, h: (b, h, 0, 0)),  # q=k=v, per head
        ],
        out_specs=pl.BlockSpec((1, 1, n, D), lambda b, h: (b, h, 0, 0)),
        compiler_params=pltpu.CompilerParams(
            dimension_semantics=("parallel", "parallel"),
            vmem_limit_bytes=_vmem_limit()),
        cost_estimate=ce,
    )(mask_f, graph_attn_bias, vln_h)


def pallas_attn_epilogue(x, xg, xb, attn_b16, vec, wo, w_ada):
    bsz, n, E = x.shape
    tn = _pick_tile(n, max_tile=256)
    row_x = pl.BlockSpec((1, tn, E), lambda b, j: (b, j, 0))
    row_v = pl.BlockSpec((1, 3, tn, E), lambda b, j: (b, 0, j, 0))
    return pl.pallas_call(
        _attn_epilogue_kernel,
        out_shape=(jax.ShapeDtypeStruct((bsz, n, E), jnp.float32),
                   jax.ShapeDtypeStruct((bsz, 3, n, E), jnp.float32)),
        grid=(bsz, n // tn),
        in_specs=[row_x,
                  _const_spec((1, E), lambda b, j: (0, 0)),
                  _const_spec((1, E), lambda b, j: (0, 0)),
                  row_v,                                              # attention output (bf16)
                  row_v,                                              # vec residual (f32)
                  _const_spec((E, E), lambda b, j: (0, 0)),           # out_proj weight
                  _const_spec((E, 2 * E), lambda b, j: (0, 0))],      # adaLN weight [scale|shift]
        out_specs=(row_x, row_v),
        compiler_params=pltpu.CompilerParams(
            dimension_semantics=("parallel", "parallel"),
            vmem_limit_bytes=_vmem_limit()),
    )(x, xg.reshape(1, E), xb.reshape(1, E), attn_b16, vec, wo, w_ada)


def pallas_mlp_epilogue(x, xg, xb, vec, vg, vb, w1, w2, w_ada):
    bsz, n, E = x.shape
    F = w1.shape[1]
    tn = _pick_tile(n, max_tile=128)
    row_x = pl.BlockSpec((1, tn, E), lambda b, j: (b, j, 0))
    row_v = pl.BlockSpec((1, 3, tn, E), lambda b, j: (b, 0, j, 0))
    return pl.pallas_call(
        _mlp_epilogue_kernel,
        out_shape=(jax.ShapeDtypeStruct((bsz, n, E), jnp.float32),
                   jax.ShapeDtypeStruct((bsz, 3, n, E), jnp.float32)),
        grid=(bsz, n // tn),
        in_specs=[row_x,
                  _const_spec((1, E), lambda b, j: (0, 0)),
                  _const_spec((1, E), lambda b, j: (0, 0)),
                  row_v,                                              # vec residual / LN input (f32)
                  _const_spec((1, E), lambda b, j: (0, 0)),
                  _const_spec((1, E), lambda b, j: (0, 0)),
                  _const_spec((E, F), lambda b, j: (0, 0)),
                  _const_spec((F, E), lambda b, j: (0, 0)),
                  _const_spec((E, 2 * E), lambda b, j: (0, 0))],
        out_specs=(row_x, row_v),
        compiler_params=pltpu.CompilerParams(
            dimension_semantics=("parallel", "parallel"),
            vmem_limit_bytes=_vmem_limit()),
    )(x, xg.reshape(1, E), xb.reshape(1, E), vec, vg.reshape(1, E), vb.reshape(1, E),
      w1, w2, w_ada)


def pallas_vec_init(pos, x, padding_mask):
    bsz, n, _ = pos.shape
    E = x.shape[-1]
    tl = _pick_tile(n, max_tile=256)
    pos_t = jnp.transpose(pos, (0, 2, 1))
    rm = padding_mask.astype(jnp.float32).reshape(bsz, n, 1)
    cm = padding_mask.astype(jnp.float32).reshape(bsz, 1, n)
    x_b = x.astype(jnp.bfloat16)
    return pl.pallas_call(
        _vec_init_kernel,
        out_shape=jax.ShapeDtypeStruct((bsz, 3, n, E), jnp.float32),
        grid=(bsz, n // tl),
        in_specs=[pl.BlockSpec((1, tl, 3), lambda b, j: (b, j, 0)),
                  pl.BlockSpec((1, 3, n), lambda b, j: (b, 0, 0)),
                  pl.BlockSpec((1, tl, 1), lambda b, j: (b, j, 0)),
                  pl.BlockSpec((1, 1, n), lambda b, j: (b, 0, 0)),
                  pl.BlockSpec((1, n, E), lambda b, j: (b, 0, 0))],
        out_specs=pl.BlockSpec((1, 3, tl, E), lambda b, j: (b, 0, j, 0)),
        compiler_params=pltpu.CompilerParams(
            dimension_semantics=("parallel", "parallel"),
            vmem_limit_bytes=_vmem_limit()),
    )(pos, pos_t, rm, cm, x_b)


# ---------------------------------------------------------------------------
# Model glue (vec stays in (bsz, 3, n, E) layout; one transpose at the very end)
# ---------------------------------------------------------------------------

def transformer_block(p, x, vec, graph_attn_bias, mask_f, num_heads):
    bsz, n, E = x.shape
    H = num_heads
    hd = E // H

    # ---- attention half ----
    vln = pallas_layernorm(vec.reshape(-1, E), p["ln_vec_g"], p["ln_vec_b"],
                           out_dtype=jnp.bfloat16).reshape(bsz, 3, n, E)
    # head-major q=k=v layout (bsz, H, n, 3*hd), matching the reference reshape/permute
    vln_h = vln.reshape(bsz, 3, n, H, hd).transpose(0, 3, 2, 1, 4).reshape(bsz, H, n, 3 * hd)
    attn_h = pallas_vec_attention(vln_h, graph_attn_bias, mask_f)                   # bf16
    attn = attn_h.reshape(bsz, H, n, 3, hd).transpose(0, 3, 2, 1, 4).reshape(bsz, 3, n, E)
    x1, vec1 = pallas_attn_epilogue(x, p["ln_x_g"], p["ln_x_b"], attn, vec,
                                    p["wo"], p["w_ada1"])

    # ---- MLP half ----
    x2, vec2 = pallas_mlp_epilogue(x1, p["x_mlp_norm_g"], p["x_mlp_norm_b"], vec1,
                                   p["vec_mlp_norm_g"], p["vec_mlp_norm_b"],
                                   p["w_mlp1"], p["w_mlp2"], p["w_ada2"])
    return x2, vec2


def vector_vanilla_transformer(params, batched_data, x, graph_attn_bias,
                               padding_mask, num_heads):
    # x arrives as (n_node, bsz, E) like the PyTorch forward; transpose once.
    x = jnp.transpose(x, (1, 0, 2)).astype(jnp.float32)               # (bsz, n, E)
    bsz, n, E = x.shape
    pos = batched_data["pos"].astype(jnp.float32)
    mask_f = padding_mask.astype(jnp.float32).reshape(bsz, 1, n)

    vec = pallas_vec_init(pos, x, padding_mask)                       # (bsz, 3, n, E) f32

    for p in params["layers"]:
        x, vec = transformer_block(p, x, vec, graph_attn_bias, mask_f, num_heads)

    x = pallas_layernorm(x.reshape(-1, E), params["ln_x_g"], params["ln_x_b"]
                         ).reshape(bsz, n, E)
    vec = pallas_layernorm(vec.reshape(-1, E), params["ln_vec_g"], params["ln_vec_b"]
                           ).reshape(bsz, 3, n, E)
    vec = jnp.transpose(vec, (0, 2, 1, 3))                            # (bsz, n, 3, E)
    # decoder_feat4energy=True -> return processed x
    return x, vec


# ---------------------------------------------------------------------------
# Deterministic parameter init (weights bf16, LN params f32)
# ---------------------------------------------------------------------------

def init_params(key, embed_dim, ffn_dim, num_layers):
    def nrm(k, shape, scale=0.1):
        return (jax.random.normal(k, shape, jnp.float32) * scale).astype(jnp.bfloat16)

    keys = iter(jax.random.split(key, num_layers * 5 + 1))
    layers = []
    for _ in range(num_layers):
        layers.append(dict(
            ln_x_g=jnp.ones((embed_dim,), jnp.float32),
            ln_x_b=jnp.zeros((embed_dim,), jnp.float32),
            ln_vec_g=jnp.ones((embed_dim,), jnp.float32),
            ln_vec_b=jnp.zeros((embed_dim,), jnp.float32),
            vec_mlp_norm_g=jnp.ones((embed_dim,), jnp.float32),
            vec_mlp_norm_b=jnp.zeros((embed_dim,), jnp.float32),
            x_mlp_norm_g=jnp.ones((embed_dim,), jnp.float32),
            x_mlp_norm_b=jnp.zeros((embed_dim,), jnp.float32),
            wo=nrm(next(keys), (embed_dim, embed_dim)),                # attn out_proj (no bias)
            w_ada1=nrm(next(keys), (embed_dim, 2 * embed_dim)),        # adaLN_modulation_vec W^T
            w_ada2=nrm(next(keys), (embed_dim, 2 * embed_dim)),        # adaLN_modulation_vec_mlp W^T
            w_mlp1=nrm(next(keys), (embed_dim, ffn_dim)),              # mlp_vec[0]
            w_mlp2=nrm(next(keys), (ffn_dim, embed_dim)),              # mlp_vec[2]
        ))
    return dict(
        layers=layers,
        ln_x_g=jnp.ones((embed_dim,), jnp.float32),
        ln_x_b=jnp.zeros((embed_dim,), jnp.float32),
        ln_vec_g=jnp.ones((embed_dim,), jnp.float32),
        ln_vec_b=jnp.zeros((embed_dim,), jnp.float32),
    )


# ---------------------------------------------------------------------------

if __name__ == "__main__":
    bsz, n_node = 2, 8
    embed_dim, ffn_dim, num_heads, num_layers = 32, 64, 4, 2

    key = jax.random.PRNGKey(0)
    k1, k2, k3, k4 = jax.random.split(key, 4)

    x = jax.random.normal(k1, (n_node, bsz, embed_dim), jnp.float32)  # (seq, batch, embed)
    pos = jax.random.normal(k2, (bsz, n_node, 3), jnp.float32) * 3.0
    graph_attn_bias = jax.random.normal(
        k3, (bsz, num_heads, n_node, n_node), jnp.float32) * 0.1
    padding_mask = jnp.zeros((bsz, n_node), jnp.bool_).at[:, -1].set(True)
    params = init_params(k4, embed_dim, ffn_dim, num_layers)

    _probe_buffered1()   # enable single-buffered constant blocks if supported on this jax/TPU

    @jax.jit
    def run(params, pos, x, bias, mask):
        return vector_vanilla_transformer(params, {"pos": pos}, x, bias, mask, num_heads)

    out_x, out_vec = run(params, pos, x, graph_attn_bias, padding_mask)
    jax.block_until_ready(out_x)
    jax.block_until_ready(out_vec)
    assert out_x.shape == (bsz, n_node, embed_dim)
    assert out_vec.shape == (bsz, n_node, 3, embed_dim)
    assert bool(jnp.all(jnp.isfinite(out_x))) and bool(jnp.all(jnp.isfinite(out_vec)))
    print("KERNEL_OK")
</pallas_src>

<mosaic_0001>
module attributes {stable_mosaic.version = 11 : i64} {
  func.func @_k(%arg0: i32, %arg1: memref<8x128xf32, #tpu.memory_space<vmem>>, %arg2: memref<8x128xf32, #tpu.memory_space<vmem>>) attributes {dimension_semantics = [#tpu.dimension_semantics<arbitrary>], iteration_bounds = array<i64: 1>, scalar_prefetch = 0 : i64, scratch_operands = 0 : i64, tpu.core_type = #tpu.core_type<tc>, window_params = [{pipeline_mode = #tpu.pipeline_mode<synchronous>, transform_indices = @transform_0, window_bounds = array<i64: 8, 128>}, {pipeline_mode = #tpu.pipeline_mode<synchronous>, transform_indices = @transform_1, window_bounds = array<i64: 8, 128>}]} {
    %c0 = arith.constant 0 : index
    %c0_0 = arith.constant 0 : index
    %0 = vector.load %arg1[%c0, %c0_0] : memref<8x128xf32, #tpu.memory_space<vmem>>, vector<8x128xf32>
    %c0_1 = arith.constant 0 : index
    %c0_2 = arith.constant 0 : index
    %1 = vector.load %arg2[%c0_1, %c0_2] : memref<8x128xf32, #tpu.memory_space<vmem>>, vector<8x128xf32>
    tpu.vector_store %arg2[%c0_1, %c0_2], %0 {strides = array<i32>} : memref<8x128xf32, #tpu.memory_space<vmem>>, vector<8x128xf32>,
    return
  }
  func.func @transform_0(%arg0: i32) -> (i32, i32) {
    %c0_i32 = arith.constant 0 : i32
    %c0_i32_0 = arith.constant 0 : i32
    %c0_i32_1 = arith.constant 0 : i32
    return %c0_i32, %c0_i32_0 : i32, i32
  }
  func.func @transform_1(%arg0: i32) -> (i32, i32) {
    %c0_i32 = arith.constant 0 : i32
    %c0_i32_0 = arith.constant 0 : i32
    %c0_i32_1 = arith.constant 0 : i32
    return %c0_i32, %c0_i32_0 : i32, i32
  }
}

module attributes {stable_mosaic.version = 11 : i64} {
  func.func @_layernorm_kernel(%arg0: i32, %arg1: memref<16x32xf32, #tpu.memory_space<vmem>>, %arg2: memref<1x32xf32, #tpu.memory_space<vmem>>, %arg3: memref<1x32xf32, #tpu.memory_space<vmem>>, %arg4: memref<16x32xbf16, #tpu.memory_space<vmem>>) attributes {dimension_semantics = [#tpu.dimension_semantics<parallel>], iteration_bounds = array<i64: 3>, scalar_prefetch = 0 : i64, scratch_operands = 0 : i64, tpu.core_type = #tpu.core_type<tc>, window_params = [{transform_indices = @transform_0, window_bounds = array<i64: 16, 32>}, {pipeline_mode = #tpu.pipeline_mode<synchronous>, transform_indices = @transform_1, window_bounds = array<i64: 1, 32>}, {pipeline_mode = #tpu.pipeline_mode<synchronous>, transform_indices = @transform_2, window_bounds = array<i64: 1, 32>}, {transform_indices = @transform_3, window_bounds = array<i64: 16, 32>}]} {
    %c0 = arith.constant 0 : index
    %c0_0 = arith.constant 0 : index
    %0 = vector.load %arg1[%c0, %c0_0] : memref<16x32xf32, #tpu.memory_space<vmem>>, vector<16x32xf32>
    %cst = arith.constant dense<0.000000e+00> : vector<16xf32>
    %1 = vector.multi_reduction <add>, %0, %cst [1] : vector<16x32xf32> to vector<16xf32>
    %2 = vector.shape_cast %1 : vector<16xf32> to vector<16x1xf32>
    %cst_1 = arith.constant 3.200000e+01 : f32
    %3 = vector.broadcast %cst_1 : f32 to vector<16x1xf32>
    %4 = arith.divf %2, %3 : vector<16x1xf32>
    %5 = vector.broadcast %4 : vector<16x1xf32> to vector<16x32xf32>
    %6 = arith.subf %0, %5 : vector<16x32xf32>
    %7 = arith.mulf %6, %6 : vector<16x32xf32>
    %cst_2 = arith.constant dense<0.000000e+00> : vector<16xf32>
    %8 = vector.multi_reduction <add>, %7, %cst_2 [1] : vector<16x32xf32> to vector<16xf32>
    %9 = vector.shape_cast %8 : vector<16xf32> to vector<16x1xf32>
    %cst_3 = arith.constant 3.200000e+01 : f32
    %10 = vector.broadcast %cst_3 : f32 to vector<16x1xf32>
    %11 = arith.divf %9, %10 : vector<16x1xf32>
    %cst_4 = arith.constant 9.99999974E-6 : f32
    %12 = vector.broadcast %cst_4 : f32 to vector<16x1xf32>
    %13 = arith.addf %11, %12 : vector<16x1xf32>
    %14 = math.rsqrt %13 : vector<16x1xf32>
    %15 = vector.broadcast %14 : vector<16x1xf32> to vector<16x32xf32>
    %16 = arith.mulf %6, %15 : vector<16x32xf32>
    %c0_5 = arith.constant 0 : index
    %c0_6 = arith.constant 0 : index
    %17 = vector.load %arg2[%c0_5, %c0_6] : memref<1x32xf32, #tpu.memory_space<vmem>>, vector<1x32xf32>
    %18 = vector.broadcast %17 : vector<1x32xf32> to vector<16x32xf32>
    %19 = arith.mulf %16, %18 : vector<16x32xf32>
    %c0_7 = arith.constant 0 : index
    %c0_8 = arith.constant 0 : index
    %20 = vector.load %arg3[%c0_7, %c0_8] : memref<1x32xf32, #tpu.memory_space<vmem>>, vector<1x32xf32>
    %21 = vector.broadcast %20 : vector<1x32xf32> to vector<16x32xf32>
    %22 = arith.addf %19, %21 : vector<16x32xf32>
    %23 = arith.truncf %22 : vector<16x32xf32> to vector<16x32xbf16>
    %c0_9 = arith.constant 0 : index
    %c0_10 = arith.constant 0 : index
    %24 = vector.load %arg4[%c0_9, %c0_10] : memref<16x32xbf16, #tpu.memory_space<vmem>>, vector<16x32xbf16>
    tpu.vector_store %arg4[%c0_9, %c0_10], %23 {strides = array<i32>} : memref<16x32xbf16, #tpu.memory_space<vmem>>, vector<16x32xbf16>,
    return
  }
  func.func @transform_0(%arg0: i32) -> (i32, i32) {
    %c0_i32 = arith.constant 0 : i32
    %c0_i32_0 = arith.constant 0 : i32
    return %arg0, %c0_i32 : i32, i32
  }
  func.func @transform_1(%arg0: i32) -> (i32, i32) {
    %c0_i32 = arith.constant 0 : i32
    %c0_i32_0 = arith.constant 0 : i32
    %c0_i32_1 = arith.constant 0 : i32
    return %c0_i32, %c0_i32_0 : i32, i32
  }
  func.func @transform_2(%arg0: i32) -> (i32, i32) {
    %c0_i32 = arith.constant 0 : i32
    %c0_i32_0 = arith.constant 0 : i32
    %c0_i32_1 = arith.constant 0 : i32
    return %c0_i32, %c0_i32_0 : i32, i32
  }
  func.func @transform_3(%arg0: i32) -> (i32, i32) {
    %c0_i32 = arith.constant 0 : i32
    %c0_i32_0 = arith.constant 0 : i32
    return %arg0, %c0_i32 : i32, i32
  }
}

module attributes {stable_mosaic.version = 11 : i64} {
  func.func @_vec_init_kernel(%arg0: i32, %arg1: i32, %arg2: memref<1x8x3xf32, #tpu.memory_space<vmem>>, %arg3: memref<1x3x8xf32, #tpu.memory_space<vmem>>, %arg4: memref<1x8x1xf32, #tpu.memory_space<vmem>>, %arg5: memref<1x1x8xf32, #tpu.memory_space<vmem>>, %arg6: memref<1x8x32xbf16, #tpu.memory_space<vmem>>, %arg7: memref<1x3x8x32xf32, #tpu.memory_space<vmem>>) attributes {dimension_semantics = [#tpu.dimension_semantics<parallel>, #tpu.dimension_semantics<parallel>], iteration_bounds = array<i64: 2, 1>, scalar_prefetch = 0 : i64, scratch_operands = 0 : i64, tpu.core_type = #tpu.core_type<tc>, window_params = [{transform_indices = @transform_0, window_bounds = array<i64: 1, 8, 3>}, {transform_indices = @transform_1, window_bounds = array<i64: 1, 3, 8>}, {transform_indices = @transform_2, window_bounds = array<i64: 1, 8, 1>}, {transform_indices = @transform_3, window_bounds = array<i64: 1, 1, 8>}, {transform_indices = @transform_4, window_bounds = array<i64: 1, 8, 32>}, {transform_indices = @transform_5, window_bounds = array<i64: 1, 3, 8, 32>}]} {
    %c0 = arith.constant 0 : index
    %c0_0 = arith.constant 0 : index
    %c0_1 = arith.constant 0 : index
    %0 = vector.load %arg2[%c0, %c0_0, %c0_1] : memref<1x8x3xf32, #tpu.memory_space<vmem>>, vector<1x8x3xf32>
    %1 = vector.shape_cast %0 : vector<1x8x3xf32> to vector<8x3xf32>
    %c0_2 = arith.constant 0 : index
    %c0_3 = arith.constant 0 : index
    %c0_4 = arith.constant 0 : index
    %2 = vector.load %arg3[%c0_2, %c0_3, %c0_4] : memref<1x3x8xf32, #tpu.memory_space<vmem>>, vector<1x3x8xf32>
    %3 = vector.shape_cast %2 : vector<1x3x8xf32> to vector<3x8xf32>
    %4 = vector.extract_strided_slice %1 {offsets = [0, 0], sizes = [8, 1], strides = [1, 1]} : vector<8x3xf32> to vector<8x1xf32>
    %5 = vector.extract_strided_slice %3 {offsets = [0, 0], sizes = [1, 8], strides = [1, 1]} : vector<3x8xf32> to vector<1x8xf32>
    %6 = vector.broadcast %4 : vector<8x1xf32> to vector<8x8xf32>
    %7 = vector.broadcast %5 : vector<1x8xf32> to vector<8x8xf32>
    %8 = arith.subf %6, %7 : vector<8x8xf32>
    %9 = vector.extract_strided_slice %1 {offsets = [0, 1], sizes = [8, 1], strides = [1, 1]} : vector<8x3xf32> to vector<8x1xf32>
    %10 = vector.extract_strided_slice %3 {offsets = [1, 0], sizes = [1, 8], strides = [1, 1]} : vector<3x8xf32> to vector<1x8xf32>
    %11 = vector.broadcast %9 : vector<8x1xf32> to vector<8x8xf32>
    %12 = vector.broadcast %10 : vector<1x8xf32> to vector<8x8xf32>
    %13 = arith.subf %11, %12 : vector<8x8xf32>
    %14 = vector.extract_strided_slice %1 {offsets = [0, 2], sizes = [8, 1], strides = [1, 1]} : vector<8x3xf32> to vector<8x1xf32>
    %15 = vector.extract_strided_slice %3 {offsets = [2, 0], sizes = [1, 8], strides = [1, 1]} : vector<3x8xf32> to vector<1x8xf32>
    %16 = vector.broadcast %14 : vector<8x1xf32> to vector<8x8xf32>
    %17 = vector.broadcast %15 : vector<1x8xf32> to vector<8x8xf32>
    %18 = arith.subf %16, %17 : vector<8x8xf32>
    %19 = arith.mulf %8, %8 : vector<8x8xf32>
    %20 = arith.mulf %13, %13 : vector<8x8xf32>
    %21 = arith.addf %19, %20 : vector<8x8xf32>
    %22 = arith.mulf %18, %18 : vector<8x8xf32>
    %23 = arith.addf %21, %22 : vector<8x8xf32>
    %24 = math.sqrt %23 : vector<8x8xf32>
    %c0_5 = arith.constant 0 : index
    %c0_6 = arith.constant 0 : index
    %c0_7 = arith.constant 0 : index
    %25 = vector.load %arg4[%c0_5, %c0_6, %c0_7] : memref<1x8x1xf32, #tpu.memory_space<vmem>>, vector<1x8x1xf32>
    %26 = vector.shape_cast %25 : vector<1x8x1xf32> to vector<8x1xf32>
    %c0_8 = arith.constant 0 : index
    %c0_9 = arith.constant 0 : index
    %c0_10 = arith.constant 0 : index
    %27 = vector.load %arg5[%c0_8, %c0_9, %c0_10] : memref<1x1x8xf32, #tpu.memory_space<vmem>>, vector<1x1x8xf32>
    %28 = vector.shape_cast %27 : vector<1x1x8xf32> to vector<1x8xf32>
    %29 = vector.broadcast %26 : vector<8x1xf32> to vector<8x8xf32>
    %30 = vector.broadcast %28 : vector<1x8xf32> to vector<8x8xf32>
    %31 = arith.maximumf %29, %30 : vector<8x8xf32>
    %cst = arith.constant 5.000000e-01 : f32
    %32 = vector.broadcast %cst : f32 to vector<8x8xf32>
    %33 = arith.cmpf ogt, %31, %32 : vector<8x8xf32>
    %cst_11 = arith.constant 1.000000e+06 : f32
    %34 = vector.broadcast %cst_11 : f32 to vector<8x8xf32>
    %35 = arith.select %33, %34, %24 : vector<8x8xi1>, vector<8x8xf32>
    %cst_12 = arith.constant 1.000000e+00 : f32
    %36 = vector.broadcast %cst_12 : f32 to vector<8x8xf32>
    %37 = arith.addf %35, %36 : vector<8x8xf32>
    %cst_13 = arith.constant 1.000000e+00 : f32
    %38 = vector.broadcast %cst_13 : f32 to vector<8x8xf32>
    %39 = arith.divf %38, %37 : vector<8x8xf32>
    %40 = arith.mulf %8, %39 : vector<8x8xf32>
    %41 = arith.mulf %13, %39 : vector<8x8xf32>
    %42 = arith.mulf %18, %39 : vector<8x8xf32>
    %43 = tpu.concatenate %40, %41, %42 in 0 : vector<8x8xf32>, vector<8x8xf32>, vector<8x8xf32> -> vector<24x8xf32>
    %44 = arith.truncf %43 : vector<24x8xf32> to vector<24x8xbf16>
    %c0_14 = arith.constant 0 : index
    %c0_15 = arith.constant 0 : index
    %c0_16 = arith.constant 0 : index
    %45 = vector.load %arg6[%c0_14, %c0_15, %c0_16] : memref<1x8x32xbf16, #tpu.memory_space<vmem>>, vector<1x8x32xbf16>
    %46 = vector.shape_cast %45 : vector<1x8x32xbf16> to vector<8x32xbf16>
    %cst_17 = arith.constant dense<0.000000e+00> : vector<24x32xf32>
    %47 = tpu.matmul %44, %46, %cst_17 {dimension_numbers = #tpu.dot_dimension_numbers<[1], [0], [0], [1], [0, 0, 1, 1], [], []>} : vector<24x8xbf16>, vector<8x32xbf16>, vector<24x32xf32> -> vector<24x32xf32>
    %48 = vector.shape_cast %47 : vector<24x32xf32> to vector<3x8x32xf32>
    %c0_18 = arith.constant 0 : index
    %c0_19 = arith.constant 0 : index
    %c0_20 = arith.constant 0 : index
    %c0_21 = arith.constant 0 : index
    %49 = vector.load %arg7[%c0_18, %c0_19, %c0_20, %c0_21] : memref<1x3x8x32xf32, #tpu.memory_space<vmem>>, vector<1x3x8x32xf32>
    %50 = vector.shape_cast %49 : vector<1x3x8x32xf32> to vector<3x8x32xf32>
    %51 = vector.shape_cast %48 : vector<3x8x32xf32> to vector<1x3x8x32xf32>
    tpu.vector_store %arg7[%c0_18, %c0_19, %c0_20, %c0_21], %51 {strides = array<i32>} : memref<1x3x8x32xf32, #tpu.memory_space<vmem>>, vector<1x3x8x32xf32>,
    return
  }
  func.func @transform_0(%arg0: i32, %arg1: i32) -> (i32, i32, i32) {
    %c0_i32 = arith.constant 0 : i32
    %c0_i32_0 = arith.constant 0 : i32
    return %arg0, %arg1, %c0_i32 : i32, i32, i32
  }
  func.func @transform_1(%arg0: i32, %arg1: i32) -> (i32, i32, i32) {
    %c0_i32 = arith.constant 0 : i32
    %c0_i32_0 = arith.constant 0 : i32
    %c0_i32_1 = arith.constant 0 : i32
    return %arg0, %c0_i32, %c0_i32_0 : i32, i32, i32
  }
  func.func @transform_2(%arg0: i32, %arg1: i32) -> (i32, i32, i32) {
    %c0_i32 = arith.constant 0 : i32
    %c0_i32_0 = arith.constant 0 : i32
    return %arg0, %arg1, %c0_i32 : i32, i32, i32
  }
  func.func @transform_3(%arg0: i32, %arg1: i32) -> (i32, i32, i32) {
    %c0_i32 = arith.constant 0 : i32
    %c0_i32_0 = arith.constant 0 : i32
    %c0_i32_1 = arith.constant 0 : i32
    return %arg0, %c0_i32, %c0_i32_0 : i32, i32, i32
  }
  func.func @transform_4(%arg0: i32, %arg1: i32) -> (i32, i32, i32) {
    %c0_i32 = arith.constant 0 : i32
    %c0_i32_0 = arith.constant 0 : i32
    %c0_i32_1 = arith.constant 0 : i32
    return %arg0, %c0_i32, %c0_i32_0 : i32, i32, i32
  }
  func.func @transform_5(%arg0: i32, %arg1: i32) -> (i32, i32, i32, i32) {
    %c0_i32 = arith.constant 0 : i32
    %c0_i32_0 = arith.constant 0 : i32
    %c0_i32_1 = arith.constant 0 : i32
    return %arg0, %c0_i32, %arg1, %c0_i32_0 : i32, i32, i32, i32
  }
}

module attributes {stable_mosaic.version = 11 : i64} {
  func.func @_vec_attn_kernel(%arg0: i32, %arg1: i32, %arg2: memref<1x1x8xf32, #tpu.memory_space<vmem>>, %arg3: memref<1x1x8x8xf32, #tpu.memory_space<vmem>>, %arg4: memref<1x1x8x24xbf16, #tpu.memory_space<vmem>>, %arg5: memref<1x1x8x24xbf16, #tpu.memory_space<vmem>>) attributes {dimension_semantics = [#tpu.dimension_semantics<parallel>, #tpu.dimension_semantics<parallel>], iteration_bounds = array<i64: 2, 4>, scalar_prefetch = 0 : i64, scratch_operands = 0 : i64, tpu.core_type = #tpu.core_type<tc>, window_params = [{transform_indices = @transform_0, window_bounds = array<i64: 1, 1, 8>}, {transform_indices = @transform_1, window_bounds = array<i64: 1, 1, 8, 8>}, {transform_indices = @transform_2, window_bounds = array<i64: 1, 1, 8, 24>}, {transform_indices = @transform_3, window_bounds = array<i64: 1, 1, 8, 24>}]} {
    %c0 = arith.constant 0 : index
    %c0_0 = arith.constant 0 : index
    %c0_1 = arith.constant 0 : index
    %c0_2 = arith.constant 0 : index
    %0 = vector.load %arg4[%c0, %c0_0, %c0_1, %c0_2] : memref<1x1x8x24xbf16, #tpu.memory_space<vmem>>, vector<1x1x8x24xbf16>
    %1 = vector.shape_cast %0 : vector<1x1x8x24xbf16> to vector<8x24xbf16>
    %2 = arith.extf %1 : vector<8x24xbf16> to vector<8x24xf32>
    %cst = arith.constant 0.204124153 : f32
    %3 = vector.broadcast %cst : f32 to vector<8x24xf32>
    %4 = arith.mulf %2, %3 : vector<8x24xf32>
    %5 = arith.truncf %4 : vector<8x24xf32> to vector<8x24xbf16>
    %cst_3 = arith.constant dense<0.000000e+00> : vector<8x8xf32>
    %6 = tpu.matmul %5, %1, %cst_3 {dimension_numbers = #tpu.dot_dimension_numbers<[1], [1], [0], [0], [0, 0, 1, 0], [], []>} : vector<8x24xbf16>, vector<8x24xbf16>, vector<8x8xf32> -> vector<8x8xf32>
    %c0_4 = arith.constant 0 : index
    %c0_5 = arith.constant 0 : index
    %c0_6 = arith.constant 0 : index
    %7 = vector.load %arg2[%c0_4, %c0_5, %c0_6] : memref<1x1x8xf32, #tpu.memory_space<vmem>>, vector<1x1x8xf32>
    %8 = vector.shape_cast %7 : vector<1x1x8xf32> to vector<1x8xf32>
    %cst_7 = arith.constant -1.000000e+30 : f32
    %9 = vector.broadcast %cst_7 : f32 to vector<1x8xf32>
    %10 = arith.mulf %8, %9 : vector<1x8xf32>
    %c0_8 = arith.constant 0 : index
    %c0_9 = arith.constant 0 : index
    %c0_10 = arith.constant 0 : index
    %c0_11 = arith.constant 0 : index
    %11 = vector.load %arg3[%c0_8, %c0_9, %c0_10, %c0_11] : memref<1x1x8x8xf32, #tpu.memory_space<vmem>>, vector<1x1x8x8xf32>
    %12 = vector.shape_cast %11 : vector<1x1x8x8xf32> to vector<8x8xf32>
    %13 = arith.addf %6, %12 : vector<8x8xf32>
    %14 = vector.broadcast %10 : vector<1x8xf32> to vector<8x8xf32>
    %15 = arith.addf %13, %14 : vector<8x8xf32>
    %cst_12 = arith.constant dense<0xFF800000> : vector<8xf32>
    %16 = vector.multi_reduction <maximumf>, %15, %cst_12 [1] : vector<8x8xf32> to vector<8xf32>
    %17 = vector.shape_cast %16 : vector<8xf32> to vector<8x1xf32>
    %18 = vector.broadcast %17 : vector<8x1xf32> to vector<8x8xf32>
    %19 = arith.subf %15, %18 : vector<8x8xf32>
    %20 = math.exp %19 : vector<8x8xf32>
    %cst_13 = arith.constant dense<0.000000e+00> : vector<8xf32>
    %21 = vector.multi_reduction <add>, %20, %cst_13 [1] : vector<8x8xf32> to vector<8xf32>
    %22 = vector.shape_cast %21 : vector<8xf32> to vector<8x1xf32>
    %23 = tpu.reciprocal %22 {approx = true} : vector<8x1xf32> -> vector<8x1xf32>
    %24 = arith.truncf %20 : vector<8x8xf32> to vector<8x8xbf16>
    %cst_14 = arith.constant dense<0.000000e+00> : vector<8x24xf32>
    %25 = tpu.matmul %24, %1, %cst_14 {dimension_numbers = #tpu.dot_dimension_numbers<[1], [0], [0], [1], [0, 0, 1, 1], [], []>} : vector<8x8xbf16>, vector<8x24xbf16>, vector<8x24xf32> -> vector<8x24xf32>
    %26 = vector.broadcast %23 : vector<8x1xf32> to vector<8x24xf32>
    %27 = arith.mulf %25, %26 : vector<8x24xf32>
    %28 = arith.truncf %27 : vector<8x24xf32> to vector<8x24xbf16>
    %c0_15 = arith.constant 0 : index
    %c0_16 = arith.constant 0 : index
    %c0_17 = arith.constant 0 : index
    %c0_18 = arith.constant 0 : index
    %29 = vector.load %arg5[%c0_15, %c0_16, %c0_17, %c0_18] : memref<1x1x8x24xbf16, #tpu.memory_space<vmem>>, vector<1x1x8x24xbf16>
    %30 = vector.shape_cast %29 : vector<1x1x8x24xbf16> to vector<8x24xbf16>
    %31 = vector.shape_cast %28 : vector<8x24xbf16> to vector<1x1x8x24xbf16>
    tpu.vector_store %arg5[%c0_15, %c0_16, %c0_17, %c0_18], %31 {strides = array<i32>} : memref<1x1x8x24xbf16, #tpu.memory_space<vmem>>, vector<1x1x8x24xbf16>,
    return
  }
  func.func @transform_0(%arg0: i32, %arg1: i32) -> (i32, i32, i32) {
    %c0_i32 = arith.constant 0 : i32
    %c0_i32_0 = arith.constant 0 : i32
    %c0_i32_1 = arith.constant 0 : i32
    return %arg0, %c0_i32, %c0_i32_0 : i32, i32, i32
  }
  func.func @transform_1(%arg0: i32, %arg1: i32) -> (i32, i32, i32, i32) {
    %c0_i32 = arith.constant 0 : i32
    %c0_i32_0 = arith.constant 0 : i32
    %c0_i32_1 = arith.constant 0 : i32
    return %arg0, %arg1, %c0_i32, %c0_i32_0 : i32, i32, i32, i32
  }
  func.func @transform_2(%arg0: i32, %arg1: i32) -> (i32, i32, i32, i32) {
    %c0_i32 = arith.constant 0 : i32
    %c0_i32_0 = arith.constant 0 : i32
    %c0_i32_1 = arith.constant 0 : i32
    return %arg0, %arg1, %c0_i32, %c0_i32_0 : i32, i32, i32, i32
  }
  func.func @transform_3(%arg0: i32, %arg1: i32) -> (i32, i32, i32, i32) {
    %c0_i32 = arith.constant 0 : i32
    %c0_i32_0 = arith.constant 0 : i32
    %c0_i32_1 = arith.constant 0 : i32
    return %arg0, %arg1, %c0_i32, %c0_i32_0 : i32, i32, i32, i32
  }
}

module attributes {stable_mosaic.version = 11 : i64} {
  func.func @_attn_epilogue_kernel(%arg0: i32, %arg1: i32, %arg2: memref<1x8x32xf32, #tpu.memory_space<vmem>>, %arg3: memref<1x32xf32, #tpu.memory_space<vmem>>, %arg4: memref<1x32xf32, #tpu.memory_space<vmem>>, %arg5: memref<1x3x8x32xbf16, #tpu.memory_space<vmem>>, %arg6: memref<1x3x8x32xf32, #tpu.memory_space<vmem>>, %arg7: memref<32x32xbf16, #tpu.memory_space<vmem>>, %arg8: memref<32x64xbf16, #tpu.memory_space<vmem>>, %arg9: memref<1x8x32xf32, #tpu.memory_space<vmem>>, %arg10: memref<1x3x8x32xf32, #tpu.memory_space<vmem>>) attributes {dimension_semantics = [#tpu.dimension_semantics<parallel>, #tpu.dimension_semantics<parallel>], iteration_bounds = array<i64: 2, 1>, scalar_prefetch = 0 : i64, scratch_operands = 0 : i64, tpu.core_type = #tpu.core_type<tc>, window_params = [{transform_indices = @transform_0, window_bounds = array<i64: 1, 8, 32>}, {pipeline_mode = #tpu.pipeline_mode<synchronous>, transform_indices = @transform_1, window_bounds = array<i64: 1, 32>}, {pipeline_mode = #tpu.pipeline_mode<synchronous>, transform_indices = @transform_2, window_bounds = array<i64: 1, 32>}, {transform_indices = @transform_3, window_bounds = array<i64: 1, 3, 8, 32>}, {transform_indices = @transform_4, window_bounds = array<i64: 1, 3, 8, 32>}, {pipeline_mode = #tpu.pipeline_mode<synchronous>, transform_indices = @transform_5, window_bounds = array<i64: 32, 32>}, {pipeline_mode = #tpu.pipeline_mode<synchronous>, transform_indices = @transform_6, window_bounds = array<i64: 32, 64>}, {transform_indices = @transform_7, window_bounds = array<i64: 1, 8, 32>}, {transform_indices = @transform_8, window_bounds = array<i64: 1, 3, 8, 32>}]} {
    %c0 = arith.constant 0 : index
    %c0_0 = arith.constant 0 : index
    %c0_1 = arith.constant 0 : index
    %c0_2 = arith.constant 0 : index
    %0 = vector.load %arg5[%c0, %c0_0, %c0_1, %c0_2] : memref<1x3x8x32xbf16, #tpu.memory_space<vmem>>, vector<1x3x8x32xbf16>
    %1 = vector.shape_cast %0 : vector<1x3x8x32xbf16> to vector<3x8x32xbf16>
    %2 = vector.shape_cast %1 : vector<3x8x32xbf16> to vector<24x32xbf16>
    %c0_3 = arith.constant 0 : index
    %c0_4 = arith.constant 0 : index
    %3 = vector.load %arg7[%c0_3, %c0_4] : memref<32x32xbf16, #tpu.memory_space<vmem>>, vector<32x32xbf16>
    %cst = arith.constant dense<0.000000e+00> : vector<24x32xf32>
    %4 = tpu.matmul %2, %3, %cst {dimension_numbers = #tpu.dot_dimension_numbers<[1], [0], [0], [1], [0, 0, 1, 1], [], []>} : vector<24x32xbf16>, vector<32x32xbf16>, vector<24x32xf32> -> vector<24x32xf32>
    %c0_5 = arith.constant 0 : index
    %c0_6 = arith.constant 0 : index
    %c0_7 = arith.constant 0 : index
    %c0_8 = arith.constant 0 : index
    %5 = vector.load %arg6[%c0_5, %c0_6, %c0_7, %c0_8] : memref<1x3x8x32xf32, #tpu.memory_space<vmem>>, vector<1x3x8x32xf32>
    %6 = vector.shape_cast %5 : vector<1x3x8x32xf32> to vector<3x8x32xf32>
    %7 = vector.shape_cast %6 : vector<3x8x32xf32> to vector<24x32xf32>
    %8 = arith.addf %4, %7 : vector<24x32xf32>
    %9 = vector.shape_cast %8 : vector<24x32xf32> to vector<3x8x32xf32>
    %c0_9 = arith.constant 0 : index
    %c0_10 = arith.constant 0 : index
    %c0_11 = arith.constant 0 : index
    %c0_12 = arith.constant 0 : index
    %10 = vector.load %arg10[%c0_9, %c0_10, %c0_11, %c0_12] : memref<1x3x8x32xf32, #tpu.memory_space<vmem>>, vector<1x3x8x32xf32>
    %11 = vector.shape_cast %10 : vector<1x3x8x32xf32> to vector<3x8x32xf32>
    %12 = vector.shape_cast %9 : vector<3x8x32xf32> to vector<1x3x8x32xf32>
    tpu.vector_store %arg10[%c0_9, %c0_10, %c0_11, %c0_12], %12 {strides = array<i32>} : memref<1x3x8x32xf32, #tpu.memory_space<vmem>>, vector<1x3x8x32xf32>,
    %13 = arith.negf %4 : vector<24x32xf32>
    %14 = math.exp %13 : vector<24x32xf32>
    %cst_13 = arith.constant 1.000000e+00 : f32
    %15 = vector.broadcast %cst_13 : f32 to vector<24x32xf32>
    %16 = arith.addf %15, %14 : vector<24x32xf32>
    %17 = arith.divf %15, %16 : vector<24x32xf32>
    %18 = arith.mulf %4, %17 : vector<24x32xf32>
    %19 = arith.truncf %18 : vector<24x32xf32> to vector<24x32xbf16>
    %c0_14 = arith.constant 0 : index
    %c0_15 = arith.constant 0 : index
    %20 = vector.load %arg8[%c0_14, %c0_15] : memref<32x64xbf16, #tpu.memory_space<vmem>>, vector<32x64xbf16>
    %cst_16 = arith.constant dense<0.000000e+00> : vector<24x64xf32>
    %21 = tpu.matmul %19, %20, %cst_16 {dimension_numbers = #tpu.dot_dimension_numbers<[1], [0], [0], [1], [0, 0, 1, 1], [], []>} : vector<24x32xbf16>, vector<32x64xbf16>, vector<24x64xf32> -> vector<24x64xf32>
    %22 = vector.shape_cast %21 : vector<24x64xf32> to vector<3x8x64xf32>
    %23 = arith.mulf %22, %22 : vector<3x8x64xf32>
    %cst_17 = arith.constant dense<0.000000e+00> : vector<8x64xf32>
    %24 = vector.multi_reduction <add>, %23, %cst_17 [0] : vector<3x8x64xf32> to vector<8x64xf32>
    %25 = vector.extract_strided_slice %24 {offsets = [0, 0], sizes = [8, 32], strides = [1, 1]} : vector<8x64xf32> to vector<8x32xf32>
    %26 = math.sqrt %25 : vector<8x32xf32>
    %27 = vector.extract_strided_slice %24 {offsets = [0, 32], sizes = [8, 32], strides = [1, 1]} : vector<8x64xf32> to vector<8x32xf32>
    %28 = math.sqrt %27 : vector<8x32xf32>
    %c0_18 = arith.constant 0 : index
    %c0_19 = arith.constant 0 : index
    %c0_20 = arith.constant 0 : index
    %29 = vector.load %arg2[%c0_18, %c0_19, %c0_20] : memref<1x8x32xf32, #tpu.memory_space<vmem>>, vector<1x8x32xf32>
    %30 = vector.shape_cast %29 : vector<1x8x32xf32> to vector<8x32xf32>
    %cst_21 = arith.constant dense<0.000000e+00> : vector<8xf32>
    %31 = vector.multi_reduction <add>, %30, %cst_21 [1] : vector<8x32xf32> to vector<8xf32>
    %32 = vector.shape_cast %31 : vector<8xf32> to vector<8x1xf32>
    %cst_22 = arith.constant 3.200000e+01 : f32
    %33 = vector.broadcast %cst_22 : f32 to vector<8x1xf32>
    %34 = arith.divf %32, %33 : vector<8x1xf32>
    %35 = vector.broadcast %34 : vector<8x1xf32> to vector<8x32xf32>
    %36 = arith.subf %30, %35 : vector<8x32xf32>
    %37 = arith.mulf %36, %36 : vector<8x32xf32>
    %cst_23 = arith.constant dense<0.000000e+00> : vector<8xf32>
    %38 = vector.multi_reduction <add>, %37, %cst_23 [1] : vector<8x32xf32> to vector<8xf32>
    %39 = vector.shape_cast %38 : vector<8xf32> to vector<8x1xf32>
    %cst_24 = arith.constant 3.200000e+01 : f32
    %40 = vector.broadcast %cst_24 : f32 to vector<8x1xf32>
    %41 = arith.divf %39, %40 : vector<8x1xf32>
    %cst_25 = arith.constant 9.99999974E-6 : f32
    %42 = vector.broadcast %cst_25 : f32 to vector<8x1xf32>
    %43 = arith.addf %41, %42 : vector<8x1xf32>
    %44 = math.rsqrt %43 : vector<8x1xf32>
    %45 = vector.broadcast %44 : vector<8x1xf32> to vector<8x32xf32>
    %46 = arith.mulf %36, %45 : vector<8x32xf32>
    %c0_26 = arith.constant 0 : index
    %c0_27 = arith.constant 0 : index
    %47 = vector.load %arg3[%c0_26, %c0_27] : memref<1x32xf32, #tpu.memory_space<vmem>>, vector<1x32xf32>
    %48 = vector.broadcast %47 : vector<1x32xf32> to vector<8x32xf32>
    %49 = arith.mulf %46, %48 : vector<8x32xf32>
    %c0_28 = arith.constant 0 : index
    %c0_29 = arith.constant 0 : index
    %50 = vector.load %arg4[%c0_28, %c0_29] : memref<1x32xf32, #tpu.memory_space<vmem>>, vector<1x32xf32>
    %51 = vector.broadcast %50 : vector<1x32xf32> to vector<8x32xf32>
    %52 = arith.addf %49, %51 : vector<8x32xf32>
    %53 = arith.mulf %52, %26 : vector<8x32xf32>
    %54 = arith.addf %53, %28 : vector<8x32xf32>
    %55 = arith.addf %54, %30 : vector<8x32xf32>
    %c0_30 = arith.constant 0 : index
    %c0_31 = arith.constant 0 : index
    %c0_32 = arith.constant 0 : index
    %56 = vector.load %arg9[%c0_30, %c0_31, %c0_32] : memref<1x8x32xf32, #tpu.memory_space<vmem>>, vector<1x8x32xf32>
    %57 = vector.shape_cast %56 : vector<1x8x32xf32> to vector<8x32xf32>
    %58 = vector.shape_cast %55 : vector<8x32xf32> to vector<1x8x32xf32>
    tpu.vector_store %arg9[%c0_30, %c0_31, %c0_32], %58 {strides = array<i32>} : memref<1x8x32xf32, #tpu.memory_space<vmem>>, vector<1x8x32xf32>,
    return
  }
  func.func @transform_0(%arg0: i32, %arg1: i32) -> (i32, i32, i32) {
    %c0_i32 = arith.constant 0 : i32
    %c0_i32_0 = arith.constant 0 : i32
    return %arg0, %arg1, %c0_i32 : i32, i32, i32
  }
  func.func @transform_1(%arg0: i32, %arg1: i32) -> (i32, i32) {
    %c0_i32 = arith.constant 0 : i32
    %c0_i32_0 = arith.constant 0 : i32
    %c0_i32_1 = arith.constant 0 : i32
    return %c0_i32, %c0_i32_0 : i32, i32
  }
  func.func @transform_2(%arg0: i32, %arg1: i32) -> (i32, i32) {
    %c0_i32 = arith.constant 0 : i32
    %c0_i32_0 = arith.constant 0 : i32
    %c0_i32_1 = arith.constant 0 : i32
    return %c0_i32, %c0_i32_0 : i32, i32
  }
  func.func @transform_3(%arg0: i32, %arg1: i32) -> (i32, i32, i32, i32) {
    %c0_i32 = arith.constant 0 : i32
    %c0_i32_0 = arith.constant 0 : i32
    %c0_i32_1 = arith.constant 0 : i32
    return %arg0, %c0_i32, %arg1, %c0_i32_0 : i32, i32, i32, i32
  }
  func.func @transform_4(%arg0: i32, %arg1: i32) -> (i32, i32, i32, i32) {
    %c0_i32 = arith.constant 0 : i32
    %c0_i32_0 = arith.constant 0 : i32
    %c0_i32_1 = arith.constant 0 : i32
    return %arg0, %c0_i32, %arg1, %c0_i32_0 : i32, i32, i32, i32
  }
  func.func @transform_5(%arg0: i32, %arg1: i32) -> (i32, i32) {
    %c0_i32 = arith.constant 0 : i32
    %c0_i32_0 = arith.constant 0 : i32
    %c0_i32_1 = arith.constant 0 : i32
    return %c0_i32, %c0_i32_0 : i32, i32
  }
  func.func @transform_6(%arg0: i32, %arg1: i32) -> (i32, i32) {
    %c0_i32 = arith.constant 0 : i32
    %c0_i32_0 = arith.constant 0 : i32
    %c0_i32_1 = arith.constant 0 : i32
    return %c0_i32, %c0_i32_0 : i32, i32
  }
  func.func @transform_7(%arg0: i32, %arg1: i32) -> (i32, i32, i32) {
    %c0_i32 = arith.constant 0 : i32
    %c0_i32_0 = arith.constant 0 : i32
    return %arg0, %arg1, %c0_i32 : i32, i32, i32
  }
  func.func @transform_8(%arg0: i32, %arg1: i32) -> (i32, i32, i32, i32) {
    %c0_i32 = arith.constant 0 : i32
    %c0_i32_0 = arith.constant 0 : i32
    %c0_i32_1 = arith.constant 0 : i32
    return %arg0, %c0_i32, %arg1, %c0_i32_0 : i32, i32, i32, i32
  }
}

module attributes {stable_mosaic.version = 11 : i64} {
  func.func @_mlp_epilogue_kernel(%arg0: i32, %arg1: i32, %arg2: memref<1x8x32xf32, #tpu.memory_space<vmem>>, %arg3: memref<1x32xf32, #tpu.memory_space<vmem>>, %arg4: memref<1x32xf32, #tpu.memory_space<vmem>>, %arg5: memref<1x3x8x32xf32, #tpu.memory_space<vmem>>, %arg6: memref<1x32xf32, #tpu.memory_space<vmem>>, %arg7: memref<1x32xf32, #tpu.memory_space<vmem>>, %arg8: memref<32x64xbf16, #tpu.memory_space<vmem>>, %arg9: memref<64x32xbf16, #tpu.memory_space<vmem>>, %arg10: memref<32x64xbf16, #tpu.memory_space<vmem>>, %arg11: memref<1x8x32xf32, #tpu.memory_space<vmem>>, %arg12: memref<1x3x8x32xf32, #tpu.memory_space<vmem>>) attributes {dimension_semantics = [#tpu.dimension_semantics<parallel>, #tpu.dimension_semantics<parallel>], iteration_bounds = array<i64: 2, 1>, scalar_prefetch = 0 : i64, scratch_operands = 0 : i64, tpu.core_type = #tpu.core_type<tc>, window_params = [{transform_indices = @transform_0, window_bounds = array<i64: 1, 8, 32>}, {pipeline_mode = #tpu.pipeline_mode<synchronous>, transform_indices = @transform_1, window_bounds = array<i64: 1, 32>}, {pipeline_mode = #tpu.pipeline_mode<synchronous>, transform_indices = @transform_2, window_bounds = array<i64: 1, 32>}, {transform_indices = @transform_3, window_bounds = array<i64: 1, 3, 8, 32>}, {pipeline_mode = #tpu.pipeline_mode<synchronous>, transform_indices = @transform_4, window_bounds = array<i64: 1, 32>}, {pipeline_mode = #tpu.pipeline_mode<synchronous>, transform_indices = @transform_5, window_bounds = array<i64: 1, 32>}, {pipeline_mode = #tpu.pipeline_mode<synchronous>, transform_indices = @transform_6, window_bounds = array<i64: 32, 64>}, {pipeline_mode = #tpu.pipeline_mode<synchronous>, transform_indices = @transform_7, window_bounds = array<i64: 64, 32>}, {pipeline_mode = #tpu.pipeline_mode<synchronous>, transform_indices = @transform_8, window_bounds = array<i64: 32, 64>}, {transform_indices = @transform_9, window_bounds = array<i64: 1, 8, 32>}, {transform_indices = @transform_10, window_bounds = array<i64: 1, 3, 8, 32>}]} {
    %c0 = arith.constant 0 : index
    %c0_0 = arith.constant 0 : index
    %c0_1 = arith.constant 0 : index
    %c0_2 = arith.constant 0 : index
    %0 = vector.load %arg5[%c0, %c0_0, %c0_1, %c0_2] : memref<1x3x8x32xf32, #tpu.memory_space<vmem>>, vector<1x3x8x32xf32>
    %1 = vector.shape_cast %0 : vector<1x3x8x32xf32> to vector<3x8x32xf32>
    %2 = vector.shape_cast %1 : vector<3x8x32xf32> to vector<24x32xf32>
    %cst = arith.constant dense<0.000000e+00> : vector<24xf32>
    %3 = vector.multi_reduction <add>, %2, %cst [1] : vector<24x32xf32> to vector<24xf32>
    %4 = vector.shape_cast %3 : vector<24xf32> to vector<24x1xf32>
    %cst_3 = arith.constant 3.200000e+01 : f32
    %5 = vector.broadcast %cst_3 : f32 to vector<24x1xf32>
    %6 = arith.divf %4, %5 : vector<24x1xf32>
    %7 = vector.broadcast %6 : vector<24x1xf32> to vector<24x32xf32>
    %8 = arith.subf %2, %7 : vector<24x32xf32>
    %9 = arith.mulf %8, %8 : vector<24x32xf32>
    %cst_4 = arith.constant dense<0.000000e+00> : vector<24xf32>
    %10 = vector.multi_reduction <add>, %9, %cst_4 [1] : vector<24x32xf32> to vector<24xf32>
    %11 = vector.shape_cast %10 : vector<24xf32> to vector<24x1xf32>
    %cst_5 = arith.constant 3.200000e+01 : f32
    %12 = vector.broadcast %cst_5 : f32 to vector<24x1xf32>
    %13 = arith.divf %11, %12 : vector<24x1xf32>
    %cst_6 = arith.constant 9.99999974E-6 : f32
    %14 = vector.broadcast %cst_6 : f32 to vector<24x1xf32>
    %15 = arith.addf %13, %14 : vector<24x1xf32>
    %16 = math.rsqrt %15 : vector<24x1xf32>
    %17 = vector.broadcast %16 : vector<24x1xf32> to vector<24x32xf32>
    %18 = arith.mulf %8, %17 : vector<24x32xf32>
    %c0_7 = arith.constant 0 : index
    %c0_8 = arith.constant 0 : index
    %19 = vector.load %arg6[%c0_7, %c0_8] : memref<1x32xf32, #tpu.memory_space<vmem>>, vector<1x32xf32>
    %20 = vector.broadcast %19 : vector<1x32xf32> to vector<24x32xf32>
    %21 = arith.mulf %18, %20 : vector<24x32xf32>
    %c0_9 = arith.constant 0 : index
    %c0_10 = arith.constant 0 : index
    %22 = vector.load %arg7[%c0_9, %c0_10] : memref<1x32xf32, #tpu.memory_space<vmem>>, vector<1x32xf32>
    %23 = vector.broadcast %22 : vector<1x32xf32> to vector<24x32xf32>
    %24 = arith.addf %21, %23 : vector<24x32xf32>
    %25 = arith.truncf %24 : vector<24x32xf32> to vector<24x32xbf16>
    %c0_11 = arith.constant 0 : index
    %c0_12 = arith.constant 0 : index
    %26 = vector.load %arg8[%c0_11, %c0_12] : memref<32x64xbf16, #tpu.memory_space<vmem>>, vector<32x64xbf16>
    %cst_13 = arith.constant dense<0.000000e+00> : vector<24x64xf32>
    %27 = tpu.matmul %25, %26, %cst_13 {dimension_numbers = #tpu.dot_dimension_numbers<[1], [0], [0], [1], [0, 0, 1, 1], [], []>} : vector<24x32xbf16>, vector<32x64xbf16>, vector<24x64xf32> -> vector<24x64xf32>
    %28 = arith.negf %27 : vector<24x64xf32>
    %29 = math.exp %28 : vector<24x64xf32>
    %cst_14 = arith.constant 1.000000e+00 : f32
    %30 = vector.broadcast %cst_14 : f32 to vector<24x64xf32>
    %31 = arith.addf %30, %29 : vector<24x64xf32>
    %32 = arith.divf %30, %31 : vector<24x64xf32>
    %33 = arith.mulf %27, %32 : vector<24x64xf32>
    %34 = arith.truncf %33 : vector<24x64xf32> to vector<24x64xbf16>
    %c0_15 = arith.constant 0 : index
    %c0_16 = arith.constant 0 : index
    %35 = vector.load %arg9[%c0_15, %c0_16] : memref<64x32xbf16, #tpu.memory_space<vmem>>, vector<64x32xbf16>
    %cst_17 = arith.constant dense<0.000000e+00> : vector<24x32xf32>
    %36 = tpu.matmul %34, %35, %cst_17 {dimension_numbers = #tpu.dot_dimension_numbers<[1], [0], [0], [1], [0, 0, 1, 1], [], []>} : vector<24x64xbf16>, vector<64x32xbf16>, vector<24x32xf32> -> vector<24x32xf32>
    %37 = arith.addf %36, %2 : vector<24x32xf32>
    %38 = vector.shape_cast %37 : vector<24x32xf32> to vector<3x8x32xf32>
    %c0_18 = arith.constant 0 : index
    %c0_19 = arith.constant 0 : index
    %c0_20 = arith.constant 0 : index
    %c0_21 = arith.constant 0 : index
    %39 = vector.load %arg12[%c0_18, %c0_19, %c0_20, %c0_21] : memref<1x3x8x32xf32, #tpu.memory_space<vmem>>, vector<1x3x8x32xf32>
    %40 = vector.shape_cast %39 : vector<1x3x8x32xf32> to vector<3x8x32xf32>
    %41 = vector.shape_cast %38 : vector<3x8x32xf32> to vector<1x3x8x32xf32>
    tpu.vector_store %arg12[%c0_18, %c0_19, %c0_20, %c0_21], %41 {strides = array<i32>} : memref<1x3x8x32xf32, #tpu.memory_space<vmem>>, vector<1x3x8x32xf32>,
    %42 = arith.negf %36 : vector<24x32xf32>
    %43 = math.exp %42 : vector<24x32xf32>
    %cst_22 = arith.constant 1.000000e+00 : f32
    %44 = vector.broadcast %cst_22 : f32 to vector<24x32xf32>
    %45 = arith.addf %44, %43 : vector<24x32xf32>
    %46 = arith.divf %44, %45 : vector<24x32xf32>
    %47 = arith.mulf %36, %46 : vector<24x32xf32>
    %48 = arith.truncf %47 : vector<24x32xf32> to vector<24x32xbf16>
    %c0_23 = arith.constant 0 : index
    %c0_24 = arith.constant 0 : index
    %49 = vector.load %arg10[%c0_23, %c0_24] : memref<32x64xbf16, #tpu.memory_space<vmem>>, vector<32x64xbf16>
    %cst_25 = arith.constant dense<0.000000e+00> : vector<24x64xf32>
    %50 = tpu.matmul %48, %49, %cst_25 {dimension_numbers = #tpu.dot_dimension_numbers<[1], [0], [0], [1], [0, 0, 1, 1], [], []>} : vector<24x32xbf16>, vector<32x64xbf16>, vector<24x64xf32> -> vector<24x64xf32>
    %51 = vector.shape_cast %50 : vector<24x64xf32> to vector<3x8x64xf32>
    %52 = arith.mulf %51, %51 : vector<3x8x64xf32>
    %cst_26 = arith.constant dense<0.000000e+00> : vector<8x64xf32>
    %53 = vector.multi_reduction <add>, %52, %cst_26 [0] : vector<3x8x64xf32> to vector<8x64xf32>
    %54 = vector.extract_strided_slice %53 {offsets = [0, 0], sizes = [8, 32], strides = [1, 1]} : vector<8x64xf32> to vector<8x32xf32>
    %55 = math.sqrt %54 : vector<8x32xf32>
    %56 = vector.extract_strided_slice %53 {offsets = [0, 32], sizes = [8, 32], strides = [1, 1]} : vector<8x64xf32> to vector<8x32xf32>
    %57 = math.sqrt %56 : vector<8x32xf32>
    %c0_27 = arith.constant 0 : index
    %c0_28 = arith.constant 0 : index
    %c0_29 = arith.constant 0 : index
    %58 = vector.load %arg2[%c0_27, %c0_28, %c0_29] : memref<1x8x32xf32, #tpu.memory_space<vmem>>, vector<1x8x32xf32>
    %59 = vector.shape_cast %58 : vector<1x8x32xf32> to vector<8x32xf32>
    %cst_30 = arith.constant dense<0.000000e+00> : vector<8xf32>
    %60 = vector.multi_reduction <add>, %59, %cst_30 [1] : vector<8x32xf32> to vector<8xf32>
    %61 = vector.shape_cast %60 : vector<8xf32> to vector<8x1xf32>
    %cst_31 = arith.constant 3.200000e+01 : f32
    %62 = vector.broadcast %cst_31 : f32 to vector<8x1xf32>
    %63 = arith.divf %61, %62 : vector<8x1xf32>
    %64 = vector.broadcast %63 : vector<8x1xf32> to vector<8x32xf32>
    %65 = arith.subf %59, %64 : vector<8x32xf32>
    %66 = arith.mulf %65, %65 : vector<8x32xf32>
    %cst_32 = arith.constant dense<0.000000e+00> : vector<8xf32>
    %67 = vector.multi_reduction <add>, %66, %cst_32 [1] : vector<8x32xf32> to vector<8xf32>
    %68 = vector.shape_cast %67 : vector<8xf32> to vector<8x1xf32>
    %cst_33 = arith.constant 3.200000e+01 : f32
    %69 = vector.broadcast %cst_33 : f32 to vector<8x1xf32>
    %70 = arith.divf %68, %69 : vector<8x1xf32>
    %cst_34 = arith.constant 9.99999974E-6 : f32
    %71 = vector.broadcast %cst_34 : f32 to vector<8x1xf32>
    %72 = arith.addf %70, %71 : vector<8x1xf32>
    %73 = math.rsqrt %72 : vector<8x1xf32>
    %74 = vector.broadcast %73 : vector<8x1xf32> to vector<8x32xf32>
    %75 = arith.mulf %65, %74 : vector<8x32xf32>
    %c0_35 = arith.constant 0 : index
    %c0_36 = arith.constant 0 : index
    %76 = vector.load %arg3[%c0_35, %c0_36] : memref<1x32xf32, #tpu.memory_space<vmem>>, vector<1x32xf32>
    %77 = vector.broadcast %76 : vector<1x32xf32> to vector<8x32xf32>
    %78 = arith.mulf %75, %77 : vector<8x32xf32>
    %c0_37 = arith.constant 0 : index
    %c0_38 = arith.constant 0 : index
    %79 = vector.load %arg4[%c0_37, %c0_38] : memref<1x32xf32, #tpu.memory_space<vmem>>, vector<1x32xf32>
    %80 = vector.broadcast %79 : vector<1x32xf32> to vector<8x32xf32>
    %81 = arith.addf %78, %80 : vector<8x32xf32>
    %82 = arith.mulf %81, %55 : vector<8x32xf32>
    %83 = arith.addf %82, %57 : vector<8x32xf32>
    %84 = arith.addf %83, %59 : vector<8x32xf32>
    %c0_39 = arith.constant 0 : index
    %c0_40 = arith.constant 0 : index
    %c0_41 = arith.constant 0 : index
    %85 = vector.load %arg11[%c0_39, %c0_40, %c0_41] : memref<1x8x32xf32, #tpu.memory_space<vmem>>, vector<1x8x32xf32>
    %86 = vector.shape_cast %85 : vector<1x8x32xf32> to vector<8x32xf32>
    %87 = vector.shape_cast %84 : vector<8x32xf32> to vector<1x8x32xf32>
    tpu.vector_store %arg11[%c0_39, %c0_40, %c0_41], %87 {strides = array<i32>} : memref<1x8x32xf32, #tpu.memory_space<vmem>>, vector<1x8x32xf32>,
    return
  }
  func.func @transform_0(%arg0: i32, %arg1: i32) -> (i32, i32, i32) {
    %c0_i32 = arith.constant 0 : i32
    %c0_i32_0 = arith.constant 0 : i32
    return %arg0, %arg1, %c0_i32 : i32, i32, i32
  }
  func.func @transform_1(%arg0: i32, %arg1: i32) -> (i32, i32) {
    %c0_i32 = arith.constant 0 : i32
    %c0_i32_0 = arith.constant 0 : i32
    %c0_i32_1 = arith.constant 0 : i32
    return %c0_i32, %c0_i32_0 : i32, i32
  }
  func.func @transform_2(%arg0: i32, %arg1: i32) -> (i32, i32) {
    %c0_i32 = arith.constant 0 : i32
    %c0_i32_0 = arith.constant 0 : i32
    %c0_i32_1 = arith.constant 0 : i32
    return %c0_i32, %c0_i32_0 : i32, i32
  }
  func.func @transform_3(%arg0: i32, %arg1: i32) -> (i32, i32, i32, i32) {
    %c0_i32 = arith.constant 0 : i32
    %c0_i32_0 = arith.constant 0 : i32
    %c0_i32_1 = arith.constant 0 : i32
    return %arg0, %c0_i32, %arg1, %c0_i32_0 : i32, i32, i32, i32
  }
  func.func @transform_4(%arg0: i32, %arg1: i32) -> (i32, i32) {
    %c0_i32 = arith.constant 0 : i32
    %c0_i32_0 = arith.constant 0 : i32
    %c0_i32_1 = arith.constant 0 : i32
    return %c0_i32, %c0_i32_0 : i32, i32
  }
  func.func @transform_5(%arg0: i32, %arg1: i32) -> (i32, i32) {
    %c0_i32 = arith.constant 0 : i32
    %c0_i32_0 = arith.constant 0 : i32
    %c0_i32_1 = arith.constant 0 : i32
    return %c0_i32, %c0_i32_0 : i32, i32
  }
  func.func @transform_6(%arg0: i32, %arg1: i32) -> (i32, i32) {
    %c0_i32 = arith.constant 0 : i32
    %c0_i32_0 = arith.constant 0 : i32
    %c0_i32_1 = arith.constant 0 : i32
    return %c0_i32, %c0_i32_0 : i32, i32
  }
  func.func @transform_7(%arg0: i32, %arg1: i32) -> (i32, i32) {
    %c0_i32 = arith.constant 0 : i32
    %c0_i32_0 = arith.constant 0 : i32
    %c0_i32_1 = arith.constant 0 : i32
    return %c0_i32, %c0_i32_0 : i32, i32
  }
  func.func @transform_8(%arg0: i32, %arg1: i32) -> (i32, i32) {
    %c0_i32 = arith.constant 0 : i32
    %c0_i32_0 = arith.constant 0 : i32
    %c0_i32_1 = arith.constant 0 : i32
    return %c0_i32, %c0_i32_0 : i32, i32
  }
  func.func @transform_9(%arg0: i32, %arg1: i32) -> (i32, i32, i32) {
    %c0_i32 = arith.constant 0 : i32
    %c0_i32_0 = arith.constant 0 : i32
    return %arg0, %arg1, %c0_i32 : i32, i32, i32
  }
  func.func @transform_10(%arg0: i32, %arg1: i32) -> (i32, i32, i32, i32) {
    %c0_i32 = arith.constant 0 : i32
    %c0_i32_0 = arith.constant 0 : i32
    %c0_i32_1 = arith.constant 0 : i32
    return %arg0, %c0_i32, %arg1, %c0_i32_0 : i32, i32, i32, i32
  }
}

module attributes {stable_mosaic.version = 11 : i64} {
  func.func @_layernorm_kernel(%arg0: i32, %arg1: memref<16x32xf32, #tpu.memory_space<vmem>>, %arg2: memref<1x32xf32, #tpu.memory_space<vmem>>, %arg3: memref<1x32xf32, #tpu.memory_space<vmem>>, %arg4: memref<16x32xf32, #tpu.memory_space<vmem>>) attributes {dimension_semantics = [#tpu.dimension_semantics<parallel>], iteration_bounds = array<i64: 3>, scalar_prefetch = 0 : i64, scratch_operands = 0 : i64, tpu.core_type = #tpu.core_type<tc>, window_params = [{transform_indices = @transform_0, window_bounds = array<i64: 16, 32>}, {pipeline_mode = #tpu.pipeline_mode<synchronous>, transform_indices = @transform_1, window_bounds = array<i64: 1, 32>}, {pipeline_mode = #tpu.pipeline_mode<synchronous>, transform_indices = @transform_2, window_bounds = array<i64: 1, 32>}, {transform_indices = @transform_3, window_bounds = array<i64: 16, 32>}]} {
    %c0 = arith.constant 0 : index
    %c0_0 = arith.constant 0 : index
    %0 = vector.load %arg1[%c0, %c0_0] : memref<16x32xf32, #tpu.memory_space<vmem>>, vector<16x32xf32>
    %cst = arith.constant dense<0.000000e+00> : vector<16xf32>
    %1 = vector.multi_reduction <add>, %0, %cst [1] : vector<16x32xf32> to vector<16xf32>
    %2 = vector.shape_cast %1 : vector<16xf32> to vector<16x1xf32>
    %cst_1 = arith.constant 3.200000e+01 : f32
    %3 = vector.broadcast %cst_1 : f32 to vector<16x1xf32>
    %4 = arith.divf %2, %3 : vector<16x1xf32>
    %5 = vector.broadcast %4 : vector<16x1xf32> to vector<16x32xf32>
    %6 = arith.subf %0, %5 : vector<16x32xf32>
    %7 = arith.mulf %6, %6 : vector<16x32xf32>
    %cst_2 = arith.constant dense<0.000000e+00> : vector<16xf32>
    %8 = vector.multi_reduction <add>, %7, %cst_2 [1] : vector<16x32xf32> to vector<16xf32>
    %9 = vector.shape_cast %8 : vector<16xf32> to vector<16x1xf32>
    %cst_3 = arith.constant 3.200000e+01 : f32
    %10 = vector.broadcast %cst_3 : f32 to vector<16x1xf32>
    %11 = arith.divf %9, %10 : vector<16x1xf32>
    %cst_4 = arith.constant 9.99999974E-6 : f32
    %12 = vector.broadcast %cst_4 : f32 to vector<16x1xf32>
    %13 = arith.addf %11, %12 : vector<16x1xf32>
    %14 = math.rsqrt %13 : vector<16x1xf32>
    %15 = vector.broadcast %14 : vector<16x1xf32> to vector<16x32xf32>
    %16 = arith.mulf %6, %15 : vector<16x32xf32>
    %c0_5 = arith.constant 0 : index
    %c0_6 = arith.constant 0 : index
    %17 = vector.load %arg2[%c0_5, %c0_6] : memref<1x32xf32, #tpu.memory_space<vmem>>, vector<1x32xf32>
    %18 = vector.broadcast %17 : vector<1x32xf32> to vector<16x32xf32>
    %19 = arith.mulf %16, %18 : vector<16x32xf32>
    %c0_7 = arith.constant 0 : index
    %c0_8 = arith.constant 0 : index
    %20 = vector.load %arg3[%c0_7, %c0_8] : memref<1x32xf32, #tpu.memory_space<vmem>>, vector<1x32xf32>
    %21 = vector.broadcast %20 : vector<1x32xf32> to vector<16x32xf32>
    %22 = arith.addf %19, %21 : vector<16x32xf32>
    %c0_9 = arith.constant 0 : index
    %c0_10 = arith.constant 0 : index
    %23 = vector.load %arg4[%c0_9, %c0_10] : memref<16x32xf32, #tpu.memory_space<vmem>>, vector<16x32xf32>
    tpu.vector_store %arg4[%c0_9, %c0_10], %22 {strides = array<i32>} : memref<16x32xf32, #tpu.memory_space<vmem>>, vector<16x32xf32>,
    return
  }
  func.func @transform_0(%arg0: i32) -> (i32, i32) {
    %c0_i32 = arith.constant 0 : i32
    %c0_i32_0 = arith.constant 0 : i32
    return %arg0, %c0_i32 : i32, i32
  }
  func.func @transform_1(%arg0: i32) -> (i32, i32) {
    %c0_i32 = arith.constant 0 : i32
    %c0_i32_0 = arith.constant 0 : i32
    %c0_i32_1 = arith.constant 0 : i32
    return %c0_i32, %c0_i32_0 : i32, i32
  }
  func.func @transform_2(%arg0: i32) -> (i32, i32) {
    %c0_i32 = arith.constant 0 : i32
    %c0_i32_0 = arith.constant 0 : i32
    %c0_i32_1 = arith.constant 0 : i32
    return %c0_i32, %c0_i32_0 : i32, i32
  }
  func.func @transform_3(%arg0: i32) -> (i32, i32) {
    %c0_i32 = arith.constant 0 : i32
    %c0_i32_0 = arith.constant 0 : i32
    return %arg0, %c0_i32 : i32, i32
  }
}

module attributes {stable_mosaic.version = 11 : i64} {
  func.func @_layernorm_kernel(%arg0: i32, %arg1: memref<16x32xf32, #tpu.memory_space<vmem>>, %arg2: memref<1x32xf32, #tpu.memory_space<vmem>>, %arg3: memref<1x32xf32, #tpu.memory_space<vmem>>, %arg4: memref<16x32xf32, #tpu.memory_space<vmem>>) attributes {dimension_semantics = [#tpu.dimension_semantics<parallel>], iteration_bounds = array<i64: 1>, scalar_prefetch = 0 : i64, scratch_operands = 0 : i64, tpu.core_type = #tpu.core_type<tc>, window_params = [{transform_indices = @transform_0, window_bounds = array<i64: 16, 32>}, {pipeline_mode = #tpu.pipeline_mode<synchronous>, transform_indices = @transform_1, window_bounds = array<i64: 1, 32>}, {pipeline_mode = #tpu.pipeline_mode<synchronous>, transform_indices = @transform_2, window_bounds = array<i64: 1, 32>}, {transform_indices = @transform_3, window_bounds = array<i64: 16, 32>}]} {
    %c0 = arith.constant 0 : index
    %c0_0 = arith.constant 0 : index
    %0 = vector.load %arg1[%c0, %c0_0] : memref<16x32xf32, #tpu.memory_space<vmem>>, vector<16x32xf32>
    %cst = arith.constant dense<0.000000e+00> : vector<16xf32>
    %1 = vector.multi_reduction <add>, %0, %cst [1] : vector<16x32xf32> to vector<16xf32>
    %2 = vector.shape_cast %1 : vector<16xf32> to vector<16x1xf32>
    %cst_1 = arith.constant 3.200000e+01 : f32
    %3 = vector.broadcast %cst_1 : f32 to vector<16x1xf32>
    %4 = arith.divf %2, %3 : vector<16x1xf32>
    %5 = vector.broadcast %4 : vector<16x1xf32> to vector<16x32xf32>
    %6 = arith.subf %0, %5 : vector<16x32xf32>
    %7 = arith.mulf %6, %6 : vector<16x32xf32>
    %cst_2 = arith.constant dense<0.000000e+00> : vector<16xf32>
    %8 = vector.multi_reduction <add>, %7, %cst_2 [1] : vector<16x32xf32> to vector<16xf32>
    %9 = vector.shape_cast %8 : vector<16xf32> to vector<16x1xf32>
    %cst_3 = arith.constant 3.200000e+01 : f32
    %10 = vector.broadcast %cst_3 : f32 to vector<16x1xf32>
    %11 = arith.divf %9, %10 : vector<16x1xf32>
    %cst_4 = arith.constant 9.99999974E-6 : f32
    %12 = vector.broadcast %cst_4 : f32 to vector<16x1xf32>
    %13 = arith.addf %11, %12 : vector<16x1xf32>
    %14 = math.rsqrt %13 : vector<16x1xf32>
    %15 = vector.broadcast %14 : vector<16x1xf32> to vector<16x32xf32>
    %16 = arith.mulf %6, %15 : vector<16x32xf32>
    %c0_5 = arith.constant 0 : index
    %c0_6 = arith.constant 0 : index
    %17 = vector.load %arg2[%c0_5, %c0_6] : memref<1x32xf32, #tpu.memory_space<vmem>>, vector<1x32xf32>
    %18 = vector.broadcast %17 : vector<1x32xf32> to vector<16x32xf32>
    %19 = arith.mulf %16, %18 : vector<16x32xf32>
    %c0_7 = arith.constant 0 : index
    %c0_8 = arith.constant 0 : index
    %20 = vector.load %arg3[%c0_7, %c0_8] : memref<1x32xf32, #tpu.memory_space<vmem>>, vector<1x32xf32>
    %21 = vector.broadcast %20 : vector<1x32xf32> to vector<16x32xf32>
    %22 = arith.addf %19, %21 : vector<16x32xf32>
    %c0_9 = arith.constant 0 : index
    %c0_10 = arith.constant 0 : index
    %23 = vector.load %arg4[%c0_9, %c0_10] : memref<16x32xf32, #tpu.memory_space<vmem>>, vector<16x32xf32>
    tpu.vector_store %arg4[%c0_9, %c0_10], %22 {strides = array<i32>} : memref<16x32xf32, #tpu.memory_space<vmem>>, vector<16x32xf32>,
    return
  }
  func.func @transform_0(%arg0: i32) -> (i32, i32) {
    %c0_i32 = arith.constant 0 : i32
    %c0_i32_0 = arith.constant 0 : i32
    return %arg0, %c0_i32 : i32, i32
  }
  func.func @transform_1(%arg0: i32) -> (i32, i32) {
    %c0_i32 = arith.constant 0 : i32
    %c0_i32_0 = arith.constant 0 : i32
    %c0_i32_1 = arith.constant 0 : i32
    return %c0_i32, %c0_i32_0 : i32, i32
  }
  func.func @transform_2(%arg0: i32) -> (i32, i32) {
    %c0_i32 = arith.constant 0 : i32
    %c0_i32_0 = arith.constant 0 : i32
    %c0_i32_1 = arith.constant 0 : i32
    return %c0_i32, %c0_i32_0 : i32, i32
  }
  func.func @transform_3(%arg0: i32) -> (i32, i32) {
    %c0_i32 = arith.constant 0 : i32
    %c0_i32_0 = arith.constant 0 : i32
    return %arg0, %c0_i32 : i32, i32
  }
}

</mosaic_0001>

<bundles_post_ra>
// kernel: tpu_custom_call.1
= control target key start
LH: loop header
LB: loop body
LE: loop exit
PB: predicated region body
PF: predicated region fallthrough
CT: control target
= control target key end

     0   :  { %6 = vsyncpa [#allocation3], 0  ;;  %s102_s0 = inlined_call_operand.hbm [shape: f32[8,128], index: 0, kind: input, shape index: {}]   ;;  %s103_s1 = inlined_call_operand.hbm [shape: f32[8,128], index: 1, kind: output, shape index: {}]  }
   0x1   :  { %7 = vsyncpa [#allocation4], 0  ;;  %s84_s6 = smov [#allocation2]  }
   0x2   :  { %s14_s7 = sshll.u32 %s84_s6, 4  ;;  %s15_s7 = int_to_ptr.vmem [resolvable:$true] %s14_s7 }
   0x3   :  { %s48_s8 = scalar_lea.vmem %s15_s7, 128  ;;  %p53_p1 = scmp.lt.s32.totalorder %s15_s7, %s15_s7 }
   0x4   :  { %p49_p0 = scmp.ne.s32.totalorder %s15_s7, %s48_s8  ;;  %p54_p2 = scmp.lt.s32.totalorder %s48_s8, %s48_s8 }
   0x6   :  { %p55_p3 = por %p54_p2, %p53_p1 }
   0x8   :  { %p56_p4 = pnand %p55_p3, %p49_p0 }
   0xa   :  { %59 = shalt.err (!%p56_p4)
}
   0xb   :  { %17 = dma.hbm_to_vmem [thread:$0]  %s102_s0, 128, %s15_s7, [#allocation3]  }
   0xc   :  { %80 = dma.done.wait [#allocation3], 128  }
   0xd   :  { %81 = vsyncadd [#allocation3], 4294967168  ;;  %s85_s11 = smov [#allocation5]   ;;  %v21_v0 = vld [vmem:[#allocation2] sm:$0xff] }
   0xe   :  { %s29_s12 = sshll.u32 %s85_s11, 4  ;;  %22 = vst [vmem:[#allocation5] sm:$0xff] %v21_v0  ;;  %s30_s12 = int_to_ptr.vmem [resolvable:$true] %s29_s12 }
   0xf   :  { %s60_s13 = scalar_lea.vmem %s30_s12, 128  ;;  %p65_p6 = scmp.lt.s32.totalorder %s30_s12, %s30_s12 }
  0x10   :  { %p61_p5 = scmp.ne.s32.totalorder %s30_s12, %s60_s13  ;;  %p66_p7 = scmp.lt.s32.totalorder %s60_s13, %s60_s13 }
  0x12   :  { %p67_p8 = por %p66_p7, %p65_p6 }
  0x14   :  { %p68_p9 = pnand %p67_p8, %p61_p5 }
  0x16   :  { %71 = shalt.err (!%p68_p9)
}
  0x17   :  { %32 = dma.vmem_to_hbm [thread:$0]  %s30_s12, 128, %s103_s1, [#allocation4]  }
  0x18   :  { %82 = dma.done.wait [#allocation4], 128  }
  0x19   :  { %83 = vsyncadd [#allocation4], 4294967168 }
  0x1a   :  { %36 = vsyncpa [#allocation3], 1 }
  0x1b   :  { %37 = vsyncpa [#allocation4], 1 }

// kernel: run.12
= control target key start
LH: loop header
LB: loop body
LE: loop exit
PB: predicated region body
PF: predicated region fallthrough
CT: control target
= control target key end

     0   :  { %s346_s12 = smov 0   ;;  %s377_s0 = inlined_call_operand.vmem [shape: f32[48,32], index: 0, kind: input, shape index: {}]   ;;  %s378_s1 = inlined_call_operand.vmem [shape: f32[1,32], index: 1, kind: input, shape index: {}]   ;;  %s379_s2 = inlined_call_operand.vmem [shape: f32[1,32], index: 2, kind: input, shape index: {}]   ;;  %s380_s3 = inlined_call_operand.vmem [shape: bf16[48,32], index: 3, kind: output, shape index: {}]  }
   0x1 LB: > { %s289_s13 = sadd.s32 4294967295, %s324_s12   ;;  %p293_p0 = scmp.ge.s32.totalorder %s324_s12, 1  ;;  %s324_s12 = sphi %s346_s12, %s13_s12  }
   0x2   : > { %p138_p1 = scmp.lt.s32.totalorder %s324_s12, 4 }
   0x4   : > { %p139_p2 = pnand %p293_p0, %p138_p1 }
   0x5   : > { %s294_s14 = sshll.u32 (!%p139_p2), %s289_s13, 1 }
   0x6   : > { %142 = sbr.rel (%p139_p2) target bundleno = 330 (0x14a), region = 32  ;;  %p163_p3 = scmp.lt.s32.totalorder (!%p139_p2), %s294_s14, 5 }
   0xb   : > { %s382_s14 = smov (!%p163_p3, %s294_s14), 5  ;;  %vm176_vm0 = vcmask 261120   ;;  %v298_v21 = vld [vmem:[%s378_s1] ss:$0 sm:$0xff]  ;;  %vm230_vm1 = vcmask 257024  }
   0xc   : > { %s295_s15 = sshll.u32 %s382_s14, 3  ;;  %v299_v23 = vld [vmem:[%s379_s2] ss:$0 sm:$0xff]  ;;  %s297_s23 = sshll.u32 %s382_s14, 2 }
   0xd   : > { %s166_s18 = scalar_lea.vmem %s377_s0, %s295_s15  ;;  %s172_s26 = scalar_lea.vmem %s380_s3, %s297_s23 }
   0xe   : > { %v174_v0 = vld [vmem:[%s166_s18] sm:$0xff]  ;;  %v175_v1 = vld [vmem:[%s166_s18 + $0x8] sm:$0xff] }
   0xf   : > { %v177_v2 = vsel %vm176_vm0, %v174_v0, 0.0  ;;  %v180_v3 = vsel %vm176_vm0, %v175_v1, 0.0 }
  0x10   : > { %178 = vadd.xlane.f32.xlu0 %v177_v2 }
  0x14   : > { %181 = vadd.xlane.f32.xlu0 %v180_v3 }
  0x99   : > { %v179_v4 = vpop.xlane.xlu0 %178 }
  0x9a   : > { %v184_v5 = vmul.f32 0.03125, %v179_v4 }
  0x9c   : > { %v186_v6 = vsub.f32 %v174_v0, %v184_v5 }
  0x9d   : > { %v182_v7 = vpop.xlane.xlu0 %181 }
  0x9e   : > { %v185_v8 = vmul.f32 0.03125, %v182_v7  ;;  %v188_v9 = vmul.f32 %v186_v6, %v186_v6 }
  0xa0   : > { %v187_v10 = vsub.f32 %v175_v1, %v185_v8  ;;  %v190_v11 = vsel %vm176_vm0, %v188_v9, 0.0 }
  0xa1   : > { %191 = vadd.xlane.f32.xlu1 %v190_v11 }
  0xa2   : > { %v189_v12 = vmul.f32 %v187_v10, %v187_v10 }
  0xa4   : > { %v193_v13 = vsel %vm176_vm0, %v189_v12, 0.0 }
  0xa5   : > { %194 = vadd.xlane.f32.xlu1 %v193_v13 }
 0x12a   : > { %v192_v14 = vpop.xlane.xlu1 %191 }
 0x12b   : > { %v196_v15 = vmul.f32 0.03125, %v192_v14 }
 0x12d   : > { %v198_v16 = vadd.f32 1e-05, %v196_v15 }
 0x12e   : > { %v195_v17 = vpop.xlane.xlu1 %194 }
 0x12f   : > { %314 = vrsqrt.f32 %v198_v16  ;;  %v197_v18 = vmul.f32 0.03125, %v195_v17 }
 0x131   : > { %v199_v19 = vadd.f32 1e-05, %v197_v18 }
 0x133   : > { %316 = vrsqrt.f32 %v199_v19 }
 0x13c   : > { %v315_v20 = vpop.eup %314 }
 0x13d   : > { %v202_v22 = vmul.f32 %v315_v20, %v186_v6 }
 0x13f   : > { %v211_v24 = vmul.f32 %v298_v21, %v202_v22 }
 0x140   : > { %v317_v25 = vpop.eup %316 }
 0x141   : > { %v220_v26 = vadd.f32 %v299_v23, %v211_v24  ;;  %v203_v27 = vmul.f32 %v317_v25, %v187_v10 }
 0x143   : > { %v304_v28 = vpack.c.bf16 %v220_v26, %v220_v26  ;;  %v212_v29 = vmul.f32 %v298_v21, %v203_v27 }
 0x145   : > { %231 = vst.msk [vmem:[%s172_s26] sm:$0xf] %vm230_vm1, %v304_v28  ;;  %v221_v30 = vadd.f32 %v299_v23, %v212_v29 }
 0x147   : > { %v305_v31 = vpack.c.bf16 %v221_v30, %v221_v30 }
 0x149   : > { %232 = vst.msk [vmem:[%s172_s26 + $0x4] sm:$0xf] %vm230_vm1, %v305_v31 }
 0x14a PF: > { %s13_s12 = sadd.s32 1, %s324_s12  }
 0x14b   : > { %p10_p4 = scmp.ge.s32.totalorder %s13_s12, 5  }
 0x14d   :  { %12 = sbr.rel (!%p10_p4) target bundleno = 1 (0x1), region = 62 }

// kernel: run.11
= control target key start
LH: loop header
LB: loop body
LE: loop exit
PB: predicated region body
PF: predicated region fallthrough
CT: control target
= control target key end

     0   :  { %s707_s18 = smov 0   ;;  %s709_s19 = smov 0   ;;  %s758_s0 = inlined_call_operand.vmem [shape: f32[2,8,3], index: 0, kind: input, shape index: {}]   ;;  %s759_s1 = inlined_call_operand.vmem [shape: f32[2,3,8], index: 1, kind: input, shape index: {}]   ;;  %s760_s2 = inlined_call_operand.vmem [shape: f32[2,8,1], index: 2, kind: input, shape index: {}]   ;;  %s761_s3 = inlined_call_operand.vmem [shape: f32[2,1,8], index: 3, kind: input, shape index: {}]   ;;  %s762_s4 = inlined_call_operand.vmem [shape: bf16[2,8,32], index: 4, kind: input, shape index: {}]   ;;  %s763_s5 = inlined_call_operand.vmem [shape: f32[2,3,8,32], index: 5, kind: output, shape index: {}]  }
   0x1   :  { %s711_s20 = smov 0  }
   0x2 LB: > { %s27_s21 = sadd.s32 1, %s668_s19  ;;  %p592_p0 = scmp.ge.s32.totalorder %s672_s20, 1  ;;  %s672_s20 = sphi %s711_s20, %s15_s20   ;;  %s668_s19 = sphi %s709_s19, %s765_s19   ;;  %s664_s18 = sphi %s707_s18, %s764_s18  }
   0x3   : > { %p29_p1 = scmp.ge.s32.totalorder %s27_s21, 2  ;;  %p245_p2 = scmp.lt.s32.totalorder %s672_s20, 3 }
   0x5   : > { %s767_s21 = smov (%p29_p1, %s27_s21), 0  ;;  %p246_p3 = pnand %p592_p0, %p245_p2 }
   0x6   : > { %p296_p4 = scmp.lt.s32.totalorder (!%p246_p3), %s664_s18, 1 }
   0x7   : > { %249 = sbr.rel (%p246_p3) target bundleno = 393 (0x189), region = 40 }
   0xc   : > { %v674_v0 = vmov 0   ;;  %v675_v1 = vmov 2   ;;  %s769_s18 = smov (!%p296_p4, %s664_s18), 1  ;;  %v676_v4 = vmov 1   ;;  %vm404_vm0 = vcmask 1043456  }
   0xd   : > { %641 = vset.pattern.permute.xlu0 %v674_v0  ;;  %643 = vset.pattern.permute.xlu1 %v675_v1  ;;  %s593_s22 = sshll.u32 %s769_s18, 3  ;;  %s594_s29 = sshll.u32 %s769_s18, 2  ;;  %v337_v7 = vlaneseq  ;;  %vm397_vm4 = vcmask 64512   ;;  %vm456_vm5 = vcmask 261120  }
   0xe   : > { %s302_s25 = scalar_lea.vmem %s758_s0, %s593_s22  ;;  %s313_s28 = scalar_lea.vmem %s760_s2, %s593_s22 }
   0xf   : > { %v330_v2 = vld [vmem:[%s302_s25] sm:$0xff]  ;;  %s320_s7 = scalar_lea.vmem %s762_s4, %s594_s29  ;;  %v338_v8 = vshrl.u32 %v337_v7, 7  ;;  %s306_s10 = scalar_lea.vmem %s759_s1, %s594_s29 }
  0x10   : > { %334 = vperm.xlu0 %641, %v330_v2   ;;  %352 = vperm.xlu1 %643, %v330_v2   ;;  %v372_v3 = vld [vmem:[%s313_s28] sm:$0xff]  ;;  %s316_s13 = scalar_lea.vmem %s761_s3, %s769_s18  ;;  %s613_s14 = smul.u32 24, %s769_s18 }
  0x11   : > { %v396_v5 = vld [vmem:[%s320_s7] sm:$0xf]  ;;  %v339_v9 = vsub.s32 0, %v338_v8  ;;  %v357_v10 = vsub.s32 2, %v338_v8  ;;  %v348_v12 = vsub.s32 1, %v338_v8 }
  0x12   : > { %612 = vmatprep.subr.msk.bf16.mxu0 %vm404_vm0, %v396_v5  ;;  %v406_v6 = vsel %vm404_vm0, %v396_v5, 0  ;;  %v331_v11 = vld [vmem:[%s306_s10] sm:$0x7]  ;;  %s328_s17 = scalar_lea.vmem %s763_s5, %s613_s14 }
  0x13   : > { %607 = vmatpush3.bf16.msra.mxu0 %v406_v6  ;;  %v340_v13 = vrot.slane %v331_v11, %v339_v9  ;;  %v358_v15 = vrot.slane %v331_v11, %v357_v10  ;;  %v349_v17 = vrot.slane %v331_v11, %v348_v12  ;;  %v598_v27 = vld [vmem:[%s316_s13] ss:$0 sm:$0xff] }
  0x14   : > { %642 = vset.pattern.permute.xlu0 %v676_v4  ;;  %644 = vset.pattern.permute.xlu1 %v674_v0 }
  0x15   : > { %343 = vperm.xlu0 %642, %v330_v2   ;;  %376 = vperm.xlu1 %644, %v372_v3  }
  0x19   : > { %645 = vset.pattern.permute.xlu0 %v674_v0 }
  0x8b   : > { %v335_v14 = vpop.permute.xlu0 %334  ;;  %v353_v16 = vpop.permute.xlu1 %352 }
  0x8c   : > { %v341_v18 = vsub.f32 %v335_v14, %v340_v13  ;;  %v359_v19 = vsub.f32 %v353_v16, %v358_v15 }
  0x8e   : > { %v360_v22 = vmul.f32 %v341_v18, %v341_v18  ;;  %v363_v24 = vmul.f32 %v359_v19, %v359_v19 }
  0x90   : > { %v344_v20 = vpop.permute.xlu0 %343  ;;  %v377_v28 = vpop.permute.xlu1 %376 }
  0x91   : > { %v350_v21 = vsub.f32 %v344_v20, %v349_v17  ;;  %v385_v29 = vmax.f32 %v377_v28, %v598_v27 }
  0x93   : > { %v361_v23 = vmul.f32 %v350_v21, %v350_v21  ;;  %vm386_vm2 = vcmp.gt.f32.partialorder %v385_v29, 0.5 }
  0x95   : > { %v362_v25 = vadd.f32 %v361_v23, %v360_v22 }
  0x97   : > { %v364_v26 = vadd.f32 %v363_v24, %v362_v25 }
  0x99   : > { %646 = vrsqrt.f32 %v364_v26  ;;  %vm367_vm1 = vcmp.eq.f32.partialorder %v364_v26, inf  ;;  %v370_v32 = vand.u32 2147483648, %v364_v26  ;;  %vm369_vm3 = vcmp.eq.f32.partialorder %v364_v26, 0.0 }
  0xa6   : > { %v647_v30 = vpop.eup %646 }
  0xa7   : > { %v366_v31 = vmul.f32 %v647_v30, %v364_v26 }
  0xa9   : > { %v368_v33 = vsel %vm367_vm1, %v364_v26, %v366_v31 }
  0xaa   : > { %v371_v34 = vsel %vm369_vm3, %v370_v32, %v368_v33 }
  0xab   : > { %v387_v35 = vsel %vm386_vm2, 1000000.0, %v371_v34 }
  0xac   : > { %v388_v36 = vadd.f32 1.0, %v387_v35 }
  0xae   : > { %648 = vrcp.f32 %v388_v36 }
  0xbb   : > { %v649_v37 = vpop.eup %648 }
  0xbc   : > { %v391_v38 = vmul.f32 %v649_v37, %v341_v18  ;;  %v392_v39 = vmul.f32 %v649_v37, %v350_v21  ;;  %v393_v40 = vmul.f32 %v649_v37, %v359_v19 }
  0xbe   : > { %v394_v41 = vpack.c.bf16 %v392_v39, %v391_v38  ;;  %v395_v42 = vpack.c.bf16 %v393_v40, %v393_v40 }
  0xc0   : > { %608 = vmatprep.mubr.msk.bf16.mxu0 %vm397_vm4, %v394_v41 }
  0xc1   : > { %609 = vmatmul.mubr.msk.bf16.vlgmr.msra.gmra.mxu0 %vm397_vm4, %v395_v42 }
 0x181   : > { %v610_v43 = vpop.f32.mrf.mxu0 }
 0x182   : > { %459 = vst.msk [vmem:[%s328_s17 + $0x10] sm:$0xff] %vm456_vm5, %v610_v43 }
 0x183   : > { %v442_v44 = vpop.f32.mrf.mxu0 }
 0x184   : > { %457 = vst.msk [vmem:[%s328_s17] sm:$0xff] %vm456_vm5, %v442_v44 }
 0x185   : > { %v611_v45 = vpop.f32.mrf.mxu0 }
 0x187   : > { %v445_v46 = vpop.f32.mrf.mxu0 }
 0x188   : > { %458 = vst.msk [vmem:[%s328_s17 + $0x8] sm:$0xff] %vm456_vm5, %v445_v46 }
 0x189 PF: > { %s15_s20 = sadd.s32 1, %s672_s20   ;;  %s764_s18 = smov %s668_s19 }
 0x18a   : > { %p12_p5 = scmp.ge.s32.totalorder %s15_s20, 4   ;;  %s765_s19 = smov %s767_s21 }
 0x18c   :  { %14 = sbr.rel (!%p12_p5) target bundleno = 2 (0x2), region = 82 }

// kernel: run.13
= control target key start
LH: loop header
LB: loop body
LE: loop exit
PB: predicated region body
PF: predicated region fallthrough
CT: control target
= control target key end

     0   :  { %s623_s12 = smov 0   ;;  %s625_s13 = smov 0   ;;  %s691_s0 = inlined_call_operand.vmem [shape: f32[2,1,8], index: 0, kind: input, shape index: {}]   ;;  %s692_s1 = inlined_call_operand.vmem [shape: f32[2,4,8,8], index: 1, kind: input, shape index: {}]   ;;  %s693_s2 = inlined_call_operand.vmem [shape: bf16[2,4,8,24], index: 2, kind: input, shape index: {}]   ;;  %s694_s3 = inlined_call_operand.vmem [shape: bf16[2,4,8,24], index: 3, kind: output, shape index: {}]  }
   0x1   :  { %s627_s14 = smov 0   ;;  %s629_s15 = smov 0  }
   0x2   :  { %s631_s16 = smov 0  }
   0x3 LB: > { %s22_s17 = sadd.s32 1, %s591_s14  ;;  %s25_s18 = sadd.s32 1, %s595_s15  ;;  %s599_s16 = sphi %s631_s16, %s13_s16   ;;  %s595_s15 = sphi %s629_s15, %s698_s15   ;;  %s591_s14 = sphi %s627_s14, %s697_s14   ;;  %s587_s13 = sphi %s625_s13, %s696_s13   ;;  %s583_s12 = sphi %s623_s12, %s695_s12  }
   0x4   : > { %p23_p0 = scmp.ge.s32.totalorder %s22_s17, 4  ;;  %p488_p1 = scmp.ge.s32.totalorder %s599_s16, 1 }
   0x5   : > { %p179_p2 = scmp.lt.s32.totalorder %s599_s16, 9 }
   0x6   : > { %s700_s17 = smov (%p23_p0, %s22_s17), 0  ;;  %s702_s18 = smov (!%p23_p0, %s25_s18), %s595_s15 }
   0x7   : > { %p180_p3 = pnand %p488_p1, %p179_p2  ;;  %p27_p4 = scmp.ge.s32.totalorder %s702_s18, 2 }
   0x8   : > { %p220_p5 = scmp.lt.s32.totalorder (!%p180_p3), %s587_s13, 1  ;;  %p225_p6 = scmp.lt.s32.totalorder (!%p180_p3), %s583_s12, 3 }
   0x9   : > { %s704_s18 = smov (%p27_p4, %s702_s18), 0  ;;  %183 = sbr.rel (%p180_p3) target bundleno = 583 (0x247), region = 32 }
   0xe   : > { %v601_v0 = vmov 0.0   ;;  %vm602_vm0 = vmmov 0   ;;  %s706_s13 = smov (!%p220_p5, %s587_s13), 1  ;;  %s708_s12 = smov (!%p225_p6, %s583_s12), 3  ;;  %vm255_vm1 = vcmask 195584   ;;  %v303_v6 = vlaneseq }
   0xf   : > { %503 = vmatprep.subr.bf16.mxu0 %v601_v0  ;;  %505 = vmatprep.mubr.msk.bf16.mxu0 %vm602_vm0, %v601_v0  ;;  %s489_s19 = sshll.u32 %s706_s13, 2  ;;  %s222_s27 = scalar_lea.vmem %s691_s0, %s706_s13  ;;  %vm309_vm2 = vcmask 64512   ;;  %vm324_vm3 = vcmask 1043456   ;;  %vm369_vm4 = vcmask 191488  }
  0x10   : > { %509 = vmatprep.subr.bf16.mxu1 %v601_v0  ;;  %511 = vmatprep.mubr.msk.bf16.mxu1 %vm602_vm0, %v601_v0  ;;  %s653_s20 = sadd.s32 %s489_s19, %s708_s12  ;;  %v304_v7 = vshrl.u32 %v303_v6, 7  ;;  %v252_v8 = vld [vmem:[%s222_s27] sm:$0x1] }
  0x11   : > { %s492_s21 = sshll.u32 %s653_s20, 2  ;;  %s490_s28 = sshll.u32 %s653_s20, 3  ;;  %v253_v9 = vmul.f32 -1e+30, %v252_v8 }
  0x12   : > { %s238_s24 = scalar_lea.vmem %s693_s2, %s492_s21  ;;  %s230_s4 = scalar_lea.vmem %s692_s1, %s490_s28  ;;  %v305_v10 = vsub.s32 0, %v304_v7 }
  0x13   : > { %v248_v1 = vld [vmem:[%s238_s24] sm:$0xf]  ;;  %s246_s7 = scalar_lea.vmem %s694_s3, %s492_s21 }
  0x14   : > { %v249_v2 = vunpack.c.l.bf16 %v248_v1  ;;  %v260_v3 = vsel %vm255_vm1, %v248_v1, 0  ;;  %v254_v11 = vld [vmem:[%s230_s4] sm:$0xff]  ;;  %v306_v12 = vrot.slane %v253_v9, %v305_v10  ;;  %v325_v20 = vsel %vm324_vm3, %v248_v1, 0 }
  0x15   : > { %504 = vmatpush3.bf16.xpose.msra.mxu0 %v260_v3  ;;  %510 = vmatpush3.bf16.msra.mxu1 %v325_v20 }
  0x16   : > { %v250_v4 = vmul.f32 0.20412415, %v249_v2 }
  0x18   : > { %v251_v5 = vpack.c.bf16 %v250_v4, %v250_v4 }
  0x1c   : > { %506 = vmatmul.mubr.msk.bf16.vlgmr.msra.gmra.mxu0 %vm255_vm1, %v251_v5 }
  0xdc   : > { %v296_v13 = vpop.f32.mrf.mxu0 }
  0xdd   : > { %v297_v14 = vadd.f32 %v296_v13, %v254_v11 }
  0xde   : > { %v507_v15 = vpop.f32.mrf.mxu0 }
  0xdf   : > { %v308_v16 = vadd.f32 %v306_v12, %v297_v14 }
  0xe0   : > { %v299_v17 = vpop.f32.mrf.mxu0 }
  0xe1   : > { %v310_v18 = vsel %vm309_vm2, %v308_v16, -inf }
  0xe2   : > { %v508_v19 = vpop.f32.mrf.mxu0  ;;  %311 = vmax.xlane.f32.xlu0 %v310_v18 }
 0x16b   : > { %v312_v21 = vpop.xlane.xlu0 %311 }
 0x16c   : > { %v313_v22 = vsub.f32 %v308_v16, %v312_v21 }
 0x16e   : > { %v314_v23 = vmul.f32 1.442695, %v313_v22 }
 0x170   : > { %557 = vpow2.f32 %v314_v23 }
 0x17d   : > { %v558_v24 = vpop.eup %557 }
 0x17e   : > { %v316_v25 = vsel %vm309_vm2, %v558_v24, 0.0  ;;  %v320_v26 = vpack.c.bf16 %v558_v24, %v558_v24 }
 0x17f   : > { %317 = vadd.xlane.f32.xlu0 %v316_v25 }
 0x180   : > { %512 = vmatmul.mubr.msk.bf16.vlgmr.msra.gmra.mxu1 %vm309_vm2, %v320_v26 }
 0x208   : > { %v318_v27 = vpop.xlane.xlu0 %317 }
 0x209   : > { %559 = vrcp.f32 %v318_v27 }
 0x216   : > { %v560_v28 = vpop.eup %559 }
 0x240   : > { %v361_v29 = vpop.f32.mrf.mxu1 }
 0x241   : > { %v367_v30 = vmul.f32 %v560_v28, %v361_v29 }
 0x242   : > { %v513_v31 = vpop.f32.mrf.mxu1 }
 0x243   : > { %v368_v32 = vpack.c.bf16 %v367_v30, %v367_v30 }
 0x244   : > { %v364_v33 = vpop.f32.mrf.mxu1 }
 0x245   : > { %370 = vst.msk [vmem:[%s246_s7] sm:$0xf] %vm369_vm4, %v368_v32 }
 0x246   : > { %v514_v34 = vpop.f32.mrf.mxu1 }
 0x247 PF: > { %s13_s16 = sadd.s32 1, %s599_s16   ;;  %s695_s12 = smov %s591_s14 }
 0x248   : > { %p10_p7 = scmp.ge.s32.totalorder %s13_s16, 10   ;;  %s696_s13 = smov %s595_s15 }
 0x249   : > { %s697_s14 = smov %s700_s17  ;;  %s698_s15 = smov %s704_s18 }
 0x24a   :  { %12 = sbr.rel (!%p10_p7) target bundleno = 3 (0x3), region = 68 }

// kernel: run.14
= control target key start
LH: loop header
LB: loop body
LE: loop exit
PB: predicated region body
PF: predicated region fallthrough
CT: control target
= control target key end

     0   :  { %s982_s27 = smov 0   ;;  %s984_s28 = smov 0   ;;  %s1071_s0 = inlined_call_operand.vmem [shape: f32[2,8,32], index: 0, kind: input, shape index: {}]   ;;  %s1072_s1 = inlined_call_operand.vmem [shape: f32[1,32], index: 1, kind: input, shape index: {}]   ;;  %s1073_s2 = inlined_call_operand.vmem [shape: f32[1,32], index: 2, kind: input, shape index: {}]   ;;  %s1074_s3 = inlined_call_operand.vmem [shape: bf16[2,3,8,32], index: 3, kind: input, shape index: {}]   ;;  %s1075_s4 = inlined_call_operand.vmem [shape: f32[2,3,8,32], index: 4, kind: input, shape index: {}]   ;;  %s1076_s5 = inlined_call_operand.vmem [shape: bf16[32,32], index: 5, kind: input, shape index: {}]   ;;  %s1077_s6 = inlined_call_operand.vmem [shape: bf16[32,64], index: 6, kind: input, shape index: {}]   ;;  %s1078_s7 = inlined_call_operand.vmem [shape: f32[2,8,32], index: 7, kind: output, shape index: {0}]   ;;  %s1079_s8 = inlined_call_operand.vmem [shape: f32[2,3,8,32], index: 8, kind: output, shape index: {1}]  }
   0x1   :  { %s986_s29 = smov 0  }
   0x2 LB: > { %s31_s30 = sadd.s32 1, %s930_s28  ;;  %p816_p0 = scmp.ge.s32.totalorder %s934_s29, 1  ;;  %s934_s29 = sphi %s986_s29, %s19_s29   ;;  %s930_s28 = sphi %s984_s28, %s1081_s28   ;;  %s926_s27 = sphi %s982_s27, %s1080_s27  }
   0x3   : > { %p33_p1 = scmp.ge.s32.totalorder %s31_s30, 2  ;;  %p315_p2 = scmp.lt.s32.totalorder %s934_s29, 3 }
   0x5   : > { %s1083_s30 = smov (%p33_p1, %s31_s30), 0  ;;  %p316_p3 = pnand %p816_p0, %p315_p2 }
   0x6   : > { %p377_p4 = scmp.lt.s32.totalorder (!%p316_p3), %s926_s27, 1  ;;  %s936_s15 = smov (!%p316_p3), 96  }
   0x7   : > { %319 = sbr.rel (%p316_p3) target bundleno = 601 (0x259), region = 48 }
   0xc   : > { %v890_v0 = vld [vmem:[%s1076_s5 + $0x8] sm:$0xff]   ;;  %v891_v1 = vld [vmem:[%s1076_s5] sm:$0xff]   ;;  %s1085_s27 = smov (!%p377_p4, %s926_s27), 1  ;;  %vm443_vm0 = vcmask 261120   ;;  %vm603_vm1 = vcmask 523264  }
   0xd   : > { %847 = vmatprep.subr.bf16.mxu0 %v890_v0  ;;  %s863_s13 = smul.u32 12, %s1085_s27  ;;  %s817_s14 = sshll.u32 %s1085_s27, 3  ;;  %v894_v6 = vld [vmem:[%s1077_s6 + $0x8] sm:$0xff]   ;;  %v895_v7 = vld [vmem:[%s1077_s6] sm:$0xff]  }
   0xe   : > { %848 = vmatpush3.bf16.msra.mxu0 %v890_v0  ;;  %s383_s17 = scalar_lea.vmem %s1071_s0, %s817_s14  ;;  %855 = vmatprep.subr.bf16.mxu1 %v894_v6  ;;  %s864_s25 = smul.u32 24, %s1085_s27  ;;  %v835_v62 = vld [vmem:[%s1072_s1] ss:$0 sm:$0xff] }
   0xf   : > { %849 = vmatprep.subr.bf16.mxu0 %v891_v1  ;;  %s391_s20 = scalar_lea.vmem %s1074_s3, %s863_s13  ;;  %v1018_v2 = vld [vmem:[%s383_s17] sm:$0xff]  ;;  %856 = vmatpush3.bf16.msra.mxu1 %v894_v6  ;;  %s406_s22 = scalar_lea.vmem %s1078_s7, %s817_s14 }
  0x10   : > { %v892_v3 = vld [vmem:[%s391_s20] sm:$0xff]   ;;  %v893_v4 = vld [vmem:[%s391_s20 + $0x8] ss:$0 sps:$4 sm:$0xff]   ;;  %v617_v5 = vsel %vm443_vm0, %v1018_v2, 0.0  ;;  %857 = vmatprep.subr.bf16.mxu1 %v895_v7  ;;  %s399_s10 = scalar_lea.vmem %s1075_s4, %s864_s25  ;;  %s414_s13 = scalar_lea.vmem %s1079_s8, %s864_s25 }
  0x11   : > { %618 = vadd.xlane.f32.xlu0 %v617_v5  ;;  %851 = vmatprep.mubr.msk.bf16.mxu0 %vm443_vm0, %v892_v3  ;;  %v500_v13 = vld [vmem:[%s399_s10 + $0x10] sm:$0xff]  ;;  %v498_v15 = vld [vmem:[%s399_s10] sm:$0xff]  ;;  %v499_v22 = vld [vmem:[%s399_s10 + $0x8] sm:$0xff] }
  0x12   : > { %850 = vmatpush3.bf16.msra.mxu0 %v891_v1  ;;  %v836_v0 = vld [vmem:[%s1073_s2] ss:$0 sm:$0xff] }
  0x13   : > { %858 = vmatpush3.bf16.msra.mxu1 %v895_v7 }
  0x15   : > { %852 = vmatmul.mubr.msk.bf16.vlgmr.msra.gmra.mxu0 %vm443_vm0, %v893_v4 }
  0x9a   : > { %v619_v8 = vpop.xlane.xlu0 %618 }
  0x9b   : > { %v621_v9 = vmul.f32 0.03125, %v619_v8 }
  0x9d   : > { %v1031_v10 = vsub.f32 %v1018_v2, %v621_v9 }
  0x9f   : > { %v623_v11 = vmul.f32 %v1031_v10, %v1031_v10 }
  0xa1   : > { %v624_v12 = vsel %vm443_vm0, %v623_v11, 0.0 }
  0xa2   : > { %625 = vadd.xlane.f32.xlu0 %v624_v12 }
  0xd5   : > { %v853_v14 = vpop.f32.mrf.mxu0 }
  0xd6   : > { %v503_v16 = vadd.f32 %v853_v14, %v500_v13  ;;  %v830_v17 = vmul.f32 -1.442695, %v853_v14 }
  0xd7   : > { %v484_v18 = vpop.f32.mrf.mxu0 }
  0xd8   : > { %506 = vst.msk [vmem:[%s414_s13 + $0x10] sm:$0xff] %vm443_vm0, %v503_v16  ;;  %896 = vpow2.f32 %v830_v17  ;;  %v501_v19 = vadd.f32 %v498_v15, %v484_v18  ;;  %v828_v20 = vmul.f32 -1.442695, %v484_v18 }
  0xd9   : > { %v854_v21 = vpop.f32.mrf.mxu0 }
  0xda   : > { %504 = vst.msk [vmem:[%s414_s13] sm:$0xff] %vm443_vm0, %v501_v19  ;;  %898 = vpow2.f32 %v828_v20 }
  0xdb   : > { %v487_v23 = vpop.f32.mrf.mxu0 }
  0xdc   : > { %v502_v24 = vadd.f32 %v499_v22, %v487_v23  ;;  %v829_v25 = vmul.f32 -1.442695, %v487_v23 }
  0xde   : > { %505 = vst.msk [vmem:[%s414_s13 + $0x8] sm:$0xff] %vm443_vm0, %v502_v24  ;;  %900 = vpow2.f32 %v829_v25 }
  0xe5   : > { %v897_v26 = vpop.eup %896 }
  0xe6   : > { %v518_v28 = vadd.f32 1.0, %v897_v26 }
  0xe7   : > { %v899_v27 = vpop.eup %898 }
  0xe8   : > { %v516_v29 = vadd.f32 1.0, %v899_v27  ;;  %902 = vrcp.f32 %v518_v28 }
  0xea   : > { %904 = vrcp.f32 %v516_v29 }
  0xeb   : > { %v901_v30 = vpop.eup %900 }
  0xec   : > { %v517_v31 = vadd.f32 1.0, %v901_v30 }
  0xee   : > { %906 = vrcp.f32 %v517_v31 }
  0xf5   : > { %v903_v32 = vpop.eup %902 }
  0xf6   : > { %v527_v35 = vmul.f32 %v903_v32, %v853_v14 }
  0xf7   : > { %v905_v33 = vpop.eup %904 }
  0xf8   : > { %v525_v37 = vmul.f32 %v905_v33, %v484_v18  ;;  %v529_v39 = vpack.c.bf16 %v527_v35, %v527_v35 }
  0xfb   : > { %v907_v34 = vpop.eup %906 }
  0xfc   : > { %v526_v36 = vmul.f32 %v907_v34, %v487_v23 }
  0xfe   : > { %v528_v38 = vpack.c.bf16 %v526_v36, %v525_v37 }
 0x100   : > { %859 = vmatprep.mubr.msk.bf16.mxu1 %vm443_vm0, %v528_v38 }
 0x101   : > { %860 = vmatmul.mubr.msk.bf16.vlgmr.msra.gmra.mxu1 %vm443_vm0, %v529_v39 }
 0x12b   : > { %v626_v57 = vpop.xlane.xlu0 %625 }
 0x12c   : > { %v627_v58 = vmul.f32 0.03125, %v626_v57 }
 0x12e   : > { %v628_v59 = vadd.f32 1e-05, %v627_v58 }
 0x1c1   : > { %v861_v40 = vpop.f32.mrf.mxu1 }
 0x1c2   : > { %v602_v45 = vmul.f32 %v861_v40, %v861_v40 }
 0x1c3   : > { %v586_v41 = vpop.f32.mrf.mxu1 }
 0x1c4   : > { %v600_v43 = vmul.f32 %v586_v41, %v586_v41  ;;  %v607_v50 = vsel %vm603_vm1, %v602_v45, 0.0 }
 0x1c5   : > { %v862_v42 = vpop.f32.mrf.mxu1 }
 0x1c6   : > { %v604_v47 = vsel %vm603_vm1, %v600_v43, 0.0 }
 0x1c7   : > { %v589_v44 = vpop.f32.mrf.mxu1 }
 0x1c8   : > { %v601_v46 = vmul.f32 %v589_v44, %v589_v44 }
 0x1ca   : > { %v605_v48 = vsel %vm603_vm1, %v601_v46, 0.0 }
 0x1cb   : > { %v606_v49 = vadd.f32 %v605_v48, %v604_v47 }
 0x1cd   : > { %v608_v51 = vadd.f32 %v607_v50, %v606_v49 }
 0x1cf   : > { %908 = vrsqrt.f32 %v608_v51  ;;  %vm611_vm2 = vcmp.eq.f32.partialorder %v608_v51, inf  ;;  %v614_v54 = vand.u32 2147483648, %v608_v51  ;;  %vm613_vm3 = vcmp.eq.f32.partialorder %v608_v51, 0.0 }
 0x1d0   : > { %910 = vrsqrt.f32 %v628_v59 }
 0x1dc   : > { %v909_v52 = vpop.eup %908 }
 0x1dd   : > { %v610_v53 = vmul.f32 %v909_v52, %v608_v51  ;;  %v911_v60 = vpop.eup %910 }
 0x1de   : > { %v630_v61 = vmul.f32 %v911_v60, %v1031_v10 }
 0x1df   : > { %v612_v55 = vsel %vm611_vm2, %v608_v51, %v610_v53 }
 0x1e0   : > { %v615_v56 = vsel %vm613_vm3, %v614_v54, %v612_v55  ;;  %v638_v63 = vmul.f32 %v835_v62, %v630_v61 }
 0x1e1   : > { %649 = vrot.lane.b32.xlu1 %v615_v56, %s936_s15 }
 0x1e2   : > { %v646_v1 = vadd.f32 %v836_v0, %v638_v63 }
 0x1e4   : > { %v647_v3 = vmul.f32 %v646_v1, %v615_v56 }
 0x253   : > { %v650_v4 = vpop.permute.xlu1 %649 }
 0x254   : > { %v652_v5 = vadd.f32 %v650_v4, %v647_v3 }
 0x256   : > { %v653_v6 = vadd.f32 %v652_v5, %v1018_v2 }
 0x258   : > { %654 = vst.msk [vmem:[%s406_s22] sm:$0xff] %vm443_vm0, %v653_v6 }
 0x259 PF: > { %s19_s29 = sadd.s32 1, %s934_s29   ;;  %s1080_s27 = smov %s930_s28 }
 0x25a   : > { %p16_p5 = scmp.ge.s32.totalorder %s19_s29, 4   ;;  %s1081_s28 = smov %s1083_s30 }
 0x25c   :  { %18 = sbr.rel (!%p16_p5) target bundleno = 2 (0x2), region = 96 }

// kernel: run.21
= control target key start
LH: loop header
LB: loop body
LE: loop exit
PB: predicated region body
PF: predicated region fallthrough
CT: control target
= control target key end

     0   :  { %8 = vsyncpa [#allocation3], 0  ;;  %s556_s0 = inlined_call_operand.vmem [shape: f32[48,32], index: 0, kind: input, shape index: {}]   ;;  %s557_s1 = inlined_call_operand.vmem [shape: f32[1,32], index: 1, kind: input, shape index: {}]   ;;  %s558_s2 = inlined_call_operand.vmem [shape: f32[1,32], index: 2, kind: input, shape index: {}]   ;;  %s559_s3 = inlined_call_operand.hbm [shape: f32[48,32], index: 3, kind: output, shape index: {}]  }
   0x1   :  { %10 = vsyncpa [#allocation3 + $0x1], 0  ;;  %s443_s12 = smov 0   ;;  %s445_s13 = smov 0  }
   0x2   :  { %s447_s14 = smov 0   ;;  %s449_s15 = smov 0  }
   0x3 LB: > { %s464_s16 = sadd.s32 4294967295, %s418_s15   ;;  %s298_s17 = sadd.s32 4294967294, %s418_s15   ;;  %s418_s15 = sphi %s449_s15, %s565_s15   ;;  %s414_s14 = sphi %s447_s14, %s564_s14   ;;  %s410_s13 = sphi %s445_s13, %s563_s13   ;;  %s406_s12 = sphi %s443_s12, %s562_s12  }
   0x4   : > { %s468_s18 = sadd.s32 1, %s418_s15   ;;  %s91_s19 = sadd.s32 1, %s414_s14 }
   0x5   : > { %s88_s20 = ssub.s32 %s418_s15, %s468_s18  ;;  %p101_p0 = scmp.ne.s32.totalorder %s414_s14, %s410_s13 }
   0x6   : > { %p89_p1 = scmp.eq.s32.totalorder %s88_s20, 0  ;;  %p102_p2 = scmp.eq.s32.totalorder %s464_s16, 2 }
   0x7   : > { %p107_p3 = scmp.ne.s32.totalorder %s410_s13, %s406_s12  ;;  %p108_p4 = scmp.eq.s32.totalorder %s298_s17, 2 }
   0x8   : > { %s479_s21 = scalar_select %p89_p1, %s414_s14, %s91_s19  }
   0x9   : > { %p481_p5 = por %p102_p2, %p101_p0  ;;  %p485_p6 = por %p108_p4, %p107_p3 }
   0xa   : > { %p301_p7 = scmp.ge.s32.totalorder %s418_s15, 1  ;;  %p141_p8 = scmp.lt.s32.totalorder %s418_s15, 4 }
   0xc   : > { %p142_p9 = pnand %p301_p7, %p141_p8 }
   0xd   : > { %s303_s24 = sshll.u32 (!%p142_p9), %s464_s16, 1  ;;  %s162_s29 = sand.u32 (!%p142_p9), 1, %s410_s13  }
   0xe   : > { %145 = sbr.rel (%p142_p9) target bundleno = 349 (0x15d), region = 32  ;;  %p166_p10 = scmp.lt.s32.totalorder (!%p142_p9), %s303_s24, 5 }
   0xf   : > { %s302_s5 = sshll.u32 (!%p142_p9), %s162_s29, 4  ;;  %s312_s8 = sshll.u32 (!%p142_p9), %s464_s16, 8 }
  0x10   : > { %s164_s9 = scalar_lea.vmem (!%p142_p9), [#allocation2], %s302_s5  ;;  %s511_s19 = scalar_lea.hbm (!%p142_p9), %s559_s3, %s312_s8 }
  0x11   : > { %s236_s10 = sshll.u32 (!%p142_p9), %s164_s9, 4  ;;  %s516_s20 = scalar_lea.sflag (!%p142_p9), [#allocation3], %s162_s29  ;;  %s513_s10 = int_to_ptr.vmem [resolvable:$true] %s236_s10 }
  0x12   : > { %s358_s16 = scalar_lea.vmem (!%p142_p9), %s513_s10, 256 }
  0x13   : > { %s567_s24 = smov (!%p166_p10, %s303_s24), 5  ;;  %vm174_vm0 = vcmask 261120   ;;  %v305_v21 = vld [vmem:[%s557_s1] ss:$0 sm:$0xff]  ;;  %p359_p11 = scmp.ne.s32.totalorder %s513_s10, %s358_s16 }
  0x14   : > { %s304_s25 = sshll.u32 %s567_s24, 3  ;;  %v306_v23 = vld [vmem:[%s558_s2] ss:$0 sm:$0xff]  ;;  %s420_s24 = smov [#allocation2]  }
  0x15   : > { %s169_s28 = scalar_lea.vmem %s556_s0, %s304_s25  ;;  %p360_p12 = pnand %p359_p11, %p481_p5 }
  0x16   : > { %v172_v0 = vld [vmem:[%s169_s28] sm:$0xff]  ;;  %v173_v1 = vld [vmem:[%s169_s28 + $0x8] sm:$0xff]  ;;  %s362_s25 = sshll.u32 %s420_s24, 4  ;;  %s363_s25 = int_to_ptr.vmem [resolvable:$false] %s362_s25 }
  0x17   : > { %v175_v2 = vsel %vm174_vm0, %v172_v0, 0.0  ;;  %v178_v3 = vsel %vm174_vm0, %v173_v1, 0.0  ;;  %p361_p13 = pneg %p360_p12  ;;  %s364_s26 = scalar_lea.vmem %s363_s25, 512 }
  0x18   : > { %176 = vadd.xlane.f32.xlu0 %v175_v2  ;;  %p365_p0 = scmp.lt.s32.totalorder %s513_s10, %s363_s25  ;;  %p366_p1 = scmp.lt.s32.totalorder %s364_s26, %s358_s16 }
  0x1a   : > { %p367_p2 = por %p366_p1, %p365_p0 }
  0x1c   : > { %179 = vadd.xlane.f32.xlu0 %v178_v3  ;;  %p368_p3 = pnand %p367_p2, %p361_p13 }
  0xa1   : > { %v177_v4 = vpop.xlane.xlu0 %176 }
  0xa2   : > { %v182_v5 = vmul.f32 0.03125, %v177_v4 }
  0xa4   : > { %v184_v6 = vsub.f32 %v172_v0, %v182_v5 }
  0xa5   : > { %v180_v7 = vpop.xlane.xlu0 %179 }
  0xa6   : > { %v183_v8 = vmul.f32 0.03125, %v180_v7  ;;  %v186_v9 = vmul.f32 %v184_v6, %v184_v6 }
  0xa8   : > { %v185_v10 = vsub.f32 %v173_v1, %v183_v8  ;;  %v188_v11 = vsel %vm174_vm0, %v186_v9, 0.0 }
  0xa9   : > { %189 = vadd.xlane.f32.xlu1 %v188_v11 }
  0xaa   : > { %v187_v12 = vmul.f32 %v185_v10, %v185_v10 }
  0xac   : > { %v191_v13 = vsel %vm174_vm0, %v187_v12, 0.0 }
  0xad   : > { %192 = vadd.xlane.f32.xlu1 %v191_v13 }
 0x132   : > { %v190_v14 = vpop.xlane.xlu1 %189 }
 0x133   : > { %v194_v15 = vmul.f32 0.03125, %v190_v14 }
 0x135   : > { %v196_v16 = vadd.f32 1e-05, %v194_v15 }
 0x136   : > { %v193_v17 = vpop.xlane.xlu1 %192 }
 0x137   : > { %354 = vrsqrt.f32 %v196_v16  ;;  %v195_v18 = vmul.f32 0.03125, %v193_v17 }
 0x139   : > { %v197_v19 = vadd.f32 1e-05, %v195_v18 }
 0x13b   : > { %356 = vrsqrt.f32 %v197_v19 }
 0x144   : > { %v355_v20 = vpop.eup %354 }
 0x145   : > { %v200_v22 = vmul.f32 %v355_v20, %v184_v6 }
 0x147   : > { %v209_v24 = vmul.f32 %v305_v21, %v200_v22 }
 0x148   : > { %v357_v25 = vpop.eup %356 }
 0x149   : > { %v201_v26 = vmul.f32 %v357_v25, %v185_v10  ;;  %v218_v27 = vadd.f32 %v306_v23, %v209_v24 }
 0x14b   : > { %v210_v28 = vmul.f32 %v305_v21, %v201_v26  ;;  %220 = vst.msk [vmem:[%s164_s9] sm:$0xff] %vm174_vm0, %v218_v27 }
 0x14d   : > { %v219_v29 = vadd.f32 %v306_v23, %v210_v28 }
 0x14f   : > { %221 = vst.msk [vmem:[%s164_s9 + $0x8] sm:$0xff] %vm174_vm0, %v219_v29 }
 0x150   : > { %371 = shalt.err (!%p368_p3)
}
 0x151   : > { %s372_s27 = scalar_lea.hbm %s511_s19, 256  ;;  %s376_s30 = scalar_lea.hbm %s559_s3, 768 }
 0x152   : > { %p373_p4 = scmp.ne.s32.totalorder %s511_s19, %s372_s27  ;;  %p377_p9 = scmp.lt.s32.totalorder %s511_s19, %s559_s3 }
 0x153   : > { %p378_p10 = scmp.lt.s32.totalorder %s376_s30, %s372_s27 }
 0x154   : > { %p374_p7 = pnand %p373_p4, %p481_p5 }
 0x155   : > { %p379_p11 = por %p378_p10, %p377_p9 }
 0x156   : > { %p375_p8 = pneg %p374_p7 }
 0x158   : > { %p380_p12 = pnand %p379_p11, %p375_p8 }
 0x15a   : > { %383 = shalt.err (!%p380_p12)
}
 0x15b   : > { %s421_s6 = smov 128   ;;  %s422_s7 = smov 8  }
 0x15c   : > { %313 = dma.vmem_to_hbm [thread:$0]  (%p481_p5), %s513_s10, 256, %s511_s19, %s516_s20, %s421_s6, %s421_s6, %s422_s7  }
 0x15d PF: > { %p319_p13 = scmp.ge.s32.totalorder %s418_s15, 2  ;;  %s251_s8 = sand.u32 1, %s406_s12  }
 0x15e   : > { %s252_s9 = scalar_lea.sflag [#allocation3], %s251_s8 }
 0x15f   : > { %p316_p0 = pnand %p319_p13, %p485_p6 }
 0x161   : > { %p317_p1 = pneg %p316_p0 }
 0x163   : > { %401 = dma.done.wait (%p317_p1), %s252_s9, 256  }
 0x164   : > { %403 = vsyncadd (%p317_p1), %s252_s9, 4294967040  ;;  %p13_p2 = scmp.ge.s32.totalorder %s468_s18, 5   ;;  %s562_s12 = smov %s410_s13 }
 0x165   : > { %s563_s13 = smov %s414_s14  ;;  %s564_s14 = smov %s479_s21 }
 0x166   : > { %s565_s15 = smov %s468_s18  ;;  %15 = sbr.rel (!%p13_p2) target bundleno = 3 (0x3), region = 67 }
 0x16b   :  { %257 = vsyncpa [#allocation3], 1 }
 0x16c   :  { %259 = vsyncpa [#allocation3 + $0x1], 1 }

// kernel: run.20
= control target key start
LH: loop header
LB: loop body
LE: loop exit
PB: predicated region body
PF: predicated region fallthrough
CT: control target
= control target key end

     0   :  { %vm17_vm0 = vcmask 261120   ;;  %s156_s0 = inlined_call_operand.vmem [shape: f32[16,32], index: 0, kind: input, shape index: {}]   ;;  %s157_s1 = inlined_call_operand.vmem [shape: f32[1,32], index: 1, kind: input, shape index: {}]   ;;  %s158_s2 = inlined_call_operand.vmem [shape: f32[1,32], index: 2, kind: input, shape index: {}]   ;;  %s159_s3 = inlined_call_operand.hbm [shape: f32[16,32], index: 3, kind: output, shape index: {}]  }
   0x1   :  { %v15_v0 = vld [vmem:[%s156_s0] sm:$0xff]  ;;  %v16_v1 = vld [vmem:[%s156_s0 + $0x8] sm:$0xff] }
   0x2   :  { %8 = vsyncpa [#allocation3], 0  ;;  %v18_v2 = vsel %vm17_vm0, %v15_v0, 0.0  ;;  %v21_v3 = vsel %vm17_vm0, %v16_v1, 0.0  ;;  %v81_v21 = vld [vmem:[%s157_s1] ss:$0 sm:$0xff] }
   0x3   :  { %19 = vadd.xlane.f32.xlu0 %v18_v2  ;;  %v82_v23 = vld [vmem:[%s158_s2] ss:$0 sm:$0xff]  ;;  %s112_s19 = smov [#allocation2]  }
   0x4   :  { %s70_s20 = sshll.u32 %s112_s19, 4  ;;  %s71_s20 = int_to_ptr.vmem [resolvable:$true] %s70_s20 }
   0x5   :  { %s90_s21 = scalar_lea.vmem %s71_s20, 256  ;;  %p95_p1 = scmp.lt.s32.totalorder %s71_s20, %s71_s20 }
   0x6   :  { %p91_p0 = scmp.ne.s32.totalorder %s71_s20, %s90_s21  ;;  %p96_p2 = scmp.lt.s32.totalorder %s90_s21, %s90_s21 }
   0x7   :  { %22 = vadd.xlane.f32.xlu0 %v21_v3 }
   0x8   :  { %p97_p3 = por %p96_p2, %p95_p1 }
   0xa   :  { %p98_p4 = pnand %p97_p3, %p91_p0 }
  0x8c   :  { %v20_v4 = vpop.xlane.xlu0 %19 }
  0x8d   :  { %v25_v5 = vmul.f32 0.03125, %v20_v4 }
  0x8f   :  { %v27_v6 = vsub.f32 %v15_v0, %v25_v5 }
  0x90   :  { %v23_v7 = vpop.xlane.xlu0 %22 }
  0x91   :  { %v26_v8 = vmul.f32 0.03125, %v23_v7  ;;  %v29_v9 = vmul.f32 %v27_v6, %v27_v6 }
  0x93   :  { %v28_v10 = vsub.f32 %v16_v1, %v26_v8  ;;  %v31_v11 = vsel %vm17_vm0, %v29_v9, 0.0 }
  0x94   :  { %32 = vadd.xlane.f32.xlu1 %v31_v11 }
  0x95   :  { %v30_v12 = vmul.f32 %v28_v10, %v28_v10 }
  0x97   :  { %v34_v13 = vsel %vm17_vm0, %v30_v12, 0.0 }
  0x98   :  { %35 = vadd.xlane.f32.xlu1 %v34_v13 }
 0x11d   :  { %v33_v14 = vpop.xlane.xlu1 %32 }
 0x11e   :  { %v37_v15 = vmul.f32 0.03125, %v33_v14 }
 0x120   :  { %v39_v16 = vadd.f32 1e-05, %v37_v15 }
 0x121   :  { %v36_v17 = vpop.xlane.xlu1 %35 }
 0x122   :  { %86 = vrsqrt.f32 %v39_v16  ;;  %v38_v18 = vmul.f32 0.03125, %v36_v17 }
 0x124   :  { %v40_v19 = vadd.f32 1e-05, %v38_v18 }
 0x126   :  { %88 = vrsqrt.f32 %v40_v19 }
 0x12f   :  { %v87_v20 = vpop.eup %86 }
 0x130   :  { %v43_v22 = vmul.f32 %v87_v20, %v27_v6 }
 0x132   :  { %v52_v24 = vmul.f32 %v81_v21, %v43_v22 }
 0x133   :  { %v89_v25 = vpop.eup %88 }
 0x134   :  { %v44_v26 = vmul.f32 %v89_v25, %v28_v10  ;;  %v61_v27 = vadd.f32 %v82_v23, %v52_v24 }
 0x136   :  { %v53_v28 = vmul.f32 %v81_v21, %v44_v26  ;;  %63 = vst.msk [vmem:[#allocation2] sm:$0xff] %vm17_vm0, %v61_v27 }
 0x138   :  { %v62_v29 = vadd.f32 %v82_v23, %v53_v28 }
 0x13a   :  { %64 = vst.msk [vmem:[#allocation2 + $0x8] sm:$0xff] %vm17_vm0, %v62_v29 }
 0x13b   :  { %101 = shalt.err (!%p98_p4)
}
 0x13c   :  { %s113_s1 = smov 128   ;;  %s114_s2 = smov 8  }
 0x13d   :  { %76 = dma.vmem_to_hbm [thread:$0]  %s71_s20, 256, %s159_s3, [#allocation3], %s113_s1, %s113_s1, %s114_s2  }
 0x13e   :  { %110 = dma.done.wait [#allocation3], 256  }
 0x13f   :  { %111 = vsyncadd [#allocation3], 4294967040 }
 0x140   :  { %80 = vsyncpa [#allocation3], 1 }

// kernel: run.15
= control target key start
LH: loop header
LB: loop body
LE: loop exit
PB: predicated region body
PF: predicated region fallthrough
CT: control target
= control target key end

     0   :  { %s1201_s13 = smov 0   ;;  %s1203_s14 = smov 0   ;;  %s1334_s0 = inlined_call_operand.vmem [shape: f32[2,8,32], index: 0, kind: input, shape index: {}]   ;;  %s1335_s1 = inlined_call_operand.vmem [shape: f32[1,32], index: 1, kind: input, shape index: {}]   ;;  %s1336_s2 = inlined_call_operand.vmem [shape: f32[1,32], index: 2, kind: input, shape index: {}]   ;;  %s1337_s3 = inlined_call_operand.vmem [shape: f32[2,3,8,32], index: 3, kind: input, shape index: {}]   ;;  %s1338_s4 = inlined_call_operand.vmem [shape: f32[1,32], index: 4, kind: input, shape index: {}]   ;;  %s1339_s5 = inlined_call_operand.vmem [shape: f32[1,32], index: 5, kind: input, shape index: {}]   ;;  %s1340_s6 = inlined_call_operand.vmem [shape: bf16[32,64], index: 6, kind: input, shape index: {}]   ;;  %s1341_s7 = inlined_call_operand.vmem [shape: bf16[64,32], index: 7, kind: input, shape index: {}]   ;;  %s1342_s8 = inlined_call_operand.vmem [shape: bf16[32,64], index: 8, kind: input, shape index: {}]   ;;  %s1343_s9 = inlined_call_operand.vmem [shape: f32[2,8,32], index: 9, kind: output, shape index: {0}]   ;;  %s1344_s10 = inlined_call_operand.vmem [shape: f32[2,3,8,32], index: 10, kind: output, shape index: {1}]  }
   0x1   :  { %s1205_s15 = smov 0  }
   0x2 LB: > { %s33_s16 = sadd.s32 1, %s1139_s14  ;;  %p980_p0 = scmp.ge.s32.totalorder %s1143_s15, 1  ;;  %s1143_s15 = sphi %s1205_s15, %s21_s15   ;;  %s1139_s14 = sphi %s1203_s14, %s1346_s14   ;;  %s1135_s13 = sphi %s1201_s13, %s1345_s13  }
   0x3   : > { %p35_p1 = scmp.ge.s32.totalorder %s33_s16, 2  ;;  %p350_p2 = scmp.lt.s32.totalorder %s1143_s15, 3 }
   0x5   : > { %s1348_s16 = smov (%p35_p1, %s33_s16), 0  ;;  %p351_p3 = pnand %p980_p0, %p350_p2 }
   0x6   : > { %p408_p4 = scmp.lt.s32.totalorder (!%p351_p3), %s1135_s13, 1 }
   0x7   : > { %354 = sbr.rel (%p351_p3) target bundleno = 1149 (0x47d), region = 56 }
   0xc   : > { %s1350_s13 = smov (!%p408_p4, %s1135_s13), 1  ;;  %vm442_vm0 = vcmask 261120   ;;  %v1079_v21 = vld [vmem:[%s1340_s6 + $0x8] sm:$0xff]   ;;  %v1080_v22 = vld [vmem:[%s1340_s6] sm:$0xff]   ;;  %v1081_v48 = vld [vmem:[%s1341_s7 + $0x18] sm:$0xff]   ;;  %vm630_vm1 = vcmask 523264  }
   0xd   : > { %s1053_s17 = smul.u32 24, %s1350_s13  ;;  %1025 = vmatprep.subr.bf16.mxu0 %v1079_v21  ;;  %v985_v34 = vld [vmem:[%s1338_s4] ss:$0 sm:$0xff]  ;;  %1033 = vmatprep.subr.bf16.mxu1 %v1081_v48  ;;  %v1082_v49 = vld [vmem:[%s1341_s7 + $0x10] sm:$0xff]   ;;  %v1083_v50 = vld [vmem:[%s1341_s7 + $0x8] sm:$0xff]   ;;  %s981_s22 = sshll.u32 %s1350_s13, 3 }
   0xe   : > { %1026 = vmatpush3.bf16.msra.mxu0 %v1079_v21  ;;  %v986_v40 = vld [vmem:[%s1339_s5] ss:$0 sm:$0xff]  ;;  %1034 = vmatpush3.bf16.msra.mxu1 %v1081_v48  ;;  %s414_s25 = scalar_lea.vmem %s1334_s0, %s981_s22 }
   0xf   : > { %s422_s20 = scalar_lea.vmem %s1337_s3, %s1053_s17  ;;  %1027 = vmatprep.subr.bf16.mxu0 %v1080_v22  ;;  %1035 = vmatprep.subr.bf16.mxu1 %v1082_v49  ;;  %v1084_v51 = vld [vmem:[%s1341_s7] sm:$0xff]   ;;  %s437_s12 = scalar_lea.vmem %s1344_s10, %s1053_s17 }
  0x10   : > { %v1227_v0 = vld [vmem:[%s422_s20] sm:$0xff]  ;;  %v1229_v1 = vld [vmem:[%s422_s20 + $0x10] sm:$0xff]  ;;  %v1231_v2 = vld [vmem:[%s422_s20 + $0x8] sm:$0xff]  ;;  %s1145_s17 = smov 96  }
  0x11   : > { %v443_v3 = vsel %vm442_vm0, %v1227_v0, 0.0  ;;  %v449_v4 = vsel %vm442_vm0, %v1229_v1, 0.0  ;;  %v446_v5 = vsel %vm442_vm0, %v1231_v2, 0.0  ;;  %v1277_v52 = vld [vmem:[%s414_s25] sm:$0xff]  ;;  %s429_s25 = scalar_lea.vmem %s1343_s9, %s981_s22 }
  0x12   : > { %444 = vadd.xlane.f32.xlu0 %v443_v3  ;;  %450 = vadd.xlane.f32.xlu1 %v449_v4  ;;  %v800_v53 = vsel %vm442_vm0, %v1277_v52, 0.0 }
  0x13   : > { %1028 = vmatpush3.bf16.msra.mxu0 %v1080_v22  ;;  %1036 = vmatpush3.bf16.msra.mxu1 %v1082_v49 }
  0x14   : > { %1037 = vmatprep.subr.bf16.mxu1 %v1083_v50 }
  0x16   : > { %447 = vadd.xlane.f32.xlu0 %v446_v5 }
  0x17   : > { %1038 = vmatpush3.bf16.msra.mxu1 %v1083_v50 }
  0x18   : > { %1039 = vmatprep.subr.bf16.mxu1 %v1084_v51 }
  0x1b   : > { %1040 = vmatpush3.bf16.msra.mxu1 %v1084_v51 }
  0x9b   : > { %v445_v6 = vpop.xlane.xlu0 %444  ;;  %v451_v7 = vpop.xlane.xlu1 %450 }
  0x9c   : > { %v453_v8 = vmul.f32 0.03125, %v445_v6  ;;  %v455_v9 = vmul.f32 0.03125, %v451_v7 }
  0x9e   : > { %v456_v10 = vsub.f32 %v1227_v0, %v453_v8  ;;  %v458_v11 = vsub.f32 %v1229_v1, %v455_v9 }
  0x9f   : > { %v448_v12 = vpop.xlane.xlu0 %447 }
  0xa0   : > { %v454_v13 = vmul.f32 0.03125, %v448_v12  ;;  %v459_v14 = vmul.f32 %v456_v10, %v456_v10  ;;  %v461_v15 = vmul.f32 %v458_v11, %v458_v11 }
  0xa2   : > { %v457_v16 = vsub.f32 %v1231_v2, %v454_v13  ;;  %v462_v17 = vsel %vm442_vm0, %v459_v14, 0.0  ;;  %v468_v18 = vsel %vm442_vm0, %v461_v15, 0.0  ;;  %v1085_v14 = vld [vmem:[%s1342_s8 + $0x8] sm:$0xff]   ;;  %v1086_v15 = vld [vmem:[%s1342_s8] sm:$0xff]  }
  0xa3   : > { %463 = vadd.xlane.f32.xlu1 %v462_v17  ;;  %1045 = vmatprep.subr.bf16.mxu0 %v1085_v14 }
  0xa4   : > { %v460_v19 = vmul.f32 %v457_v16, %v457_v16 }
  0xa6   : > { %v465_v20 = vsel %vm442_vm0, %v460_v19, 0.0 }
  0xa7   : > { %469 = vadd.xlane.f32.xlu1 %v468_v18  ;;  %466 = vadd.xlane.f32.xlu0 %v465_v20 }
  0xab   : > { %801 = vadd.xlane.f32.xlu0 %v800_v53 }
 0x12c   : > { %v464_v23 = vpop.xlane.xlu1 %463 }
 0x12d   : > { %v471_v24 = vmul.f32 0.03125, %v464_v23 }
 0x12f   : > { %v474_v25 = vadd.f32 1e-05, %v471_v24 }
 0x130   : > { %v470_v26 = vpop.xlane.xlu1 %469  ;;  %v467_v27 = vpop.xlane.xlu0 %466 }
 0x131   : > { %1087 = vrsqrt.f32 %v474_v25  ;;  %v473_v28 = vmul.f32 0.03125, %v470_v26  ;;  %v472_v29 = vmul.f32 0.03125, %v467_v27 }
 0x133   : > { %v476_v30 = vadd.f32 1e-05, %v473_v28  ;;  %v475_v31 = vadd.f32 1e-05, %v472_v29 }
 0x135   : > { %1089 = vrsqrt.f32 %v476_v30 }
 0x136   : > { %1091 = vrsqrt.f32 %v475_v31 }
 0x13e   : > { %v1088_v32 = vpop.eup %1087 }
 0x13f   : > { %v480_v33 = vmul.f32 %v1088_v32, %v456_v10 }
 0x141   : > { %v490_v39 = vmul.f32 %v985_v34, %v480_v33 }
 0x142   : > { %v1090_v35 = vpop.eup %1089 }
 0x143   : > { %v1092_v36 = vpop.eup %1091  ;;  %v482_v37 = vmul.f32 %v1090_v35, %v458_v11  ;;  %v500_v44 = vadd.f32 %v986_v40, %v490_v39 }
 0x144   : > { %v481_v38 = vmul.f32 %v1092_v36, %v457_v16  ;;  %v802_v16 = vpop.xlane.xlu0 %801 }
 0x145   : > { %v492_v41 = vmul.f32 %v985_v34, %v482_v37  ;;  %v803_v17 = vmul.f32 0.03125, %v802_v16 }
 0x146   : > { %v491_v42 = vmul.f32 %v985_v34, %v481_v38 }
 0x147   : > { %v502_v43 = vadd.f32 %v986_v40, %v492_v41  ;;  %v1290_v18 = vsub.f32 %v1277_v52, %v803_v17 }
 0x148   : > { %v501_v45 = vadd.f32 %v986_v40, %v491_v42 }
 0x149   : > { %v504_v46 = vpack.c.bf16 %v502_v43, %v502_v43  ;;  %v805_v19 = vmul.f32 %v1290_v18, %v1290_v18 }
 0x14a   : > { %v503_v47 = vpack.c.bf16 %v501_v45, %v500_v44 }
 0x14b   : > { %v806_v20 = vsel %vm442_vm0, %v805_v19, 0.0 }
 0x14c   : > { %1029 = vmatprep.mubr.msk.bf16.mxu0 %vm442_vm0, %v503_v47  ;;  %807 = vadd.xlane.f32.xlu1 %v806_v20 }
 0x14d   : > { %1030 = vmatmul.mubr.msk.bf16.vlgmr.msra.gmra.mxu0 %vm442_vm0, %v504_v46 }
 0x14e   : > { %1046 = vmatpush3.bf16.msra.mxu0 %v1085_v14 }
 0x14f   : > { %1047 = vmatprep.subr.bf16.mxu0 %v1086_v15 }
 0x152   : > { %1048 = vmatpush3.bf16.msra.mxu0 %v1086_v15 }
 0x20d   : > { %v1031_v54 = vpop.f32.mrf.mxu0 }
 0x20e   : > { %v993_v55 = vmul.f32 -1.442695, %v1031_v54 }
 0x20f   : > { %v561_v56 = vpop.f32.mrf.mxu0 }
 0x210   : > { %1093 = vpow2.f32 %v993_v55  ;;  %v991_v57 = vmul.f32 -1.442695, %v561_v56 }
 0x211   : > { %v1032_v58 = vpop.f32.mrf.mxu0 }
 0x212   : > { %1095 = vpow2.f32 %v991_v57 }
 0x213   : > { %v564_v59 = vpop.f32.mrf.mxu0 }
 0x214   : > { %v992_v60 = vmul.f32 -1.442695, %v564_v59 }
 0x216   : > { %1097 = vpow2.f32 %v992_v60  ;;  %v808_v60 = vpop.xlane.xlu1 %807 }
 0x21d   : > { %v1094_v61 = vpop.eup %1093 }
 0x21e   : > { %v586_v63 = vadd.f32 1.0, %v1094_v61  ;;  %v809_v61 = vmul.f32 0.03125, %v808_v60 }
 0x21f   : > { %v1096_v62 = vpop.eup %1095 }
 0x220   : > { %v584_v3 = vadd.f32 1.0, %v1096_v62  ;;  %1099 = vrcp.f32 %v586_v63  ;;  %v810_v62 = vadd.f32 1e-05, %v809_v61 }
 0x222   : > { %1101 = vrcp.f32 %v584_v3 }
 0x223   : > { %v1098_v4 = vpop.eup %1097 }
 0x224   : > { %v585_v5 = vadd.f32 1.0, %v1098_v4  ;;  %v1007_v4 = vld [vmem:[%s1335_s1] ss:$0 sm:$0xff] }
 0x226   : > { %1103 = vrcp.f32 %v585_v5 }
 0x22d   : > { %v1100_v6 = vpop.eup %1099 }
 0x22e   : > { %v595_v9 = vmul.f32 %v1100_v6, %v1031_v54  ;;  %v1008_v6 = vld [vmem:[%s1336_s2] ss:$0 sm:$0xff] }
 0x22f   : > { %v1102_v7 = vpop.eup %1101 }
 0x230   : > { %v593_v10 = vmul.f32 %v1102_v7, %v561_v56  ;;  %v597_v13 = vpack.c.bf16 %v595_v9, %v595_v9 }
 0x233   : > { %v1104_v8 = vpop.eup %1103 }
 0x234   : > { %v594_v11 = vmul.f32 %v1104_v8, %v564_v59 }
 0x236   : > { %v596_v12 = vpack.c.bf16 %v594_v11, %v593_v10 }
 0x238   : > { %1041 = vmatprep.mubr.msk.bf16.mxu1 %vm630_vm1, %v596_v12 }
 0x239   : > { %1042 = vmatmul.mubr.msk.bf16.vlgmr.msra.gmra.mxu1 %vm630_vm1, %v597_v13 }
 0x2f9   : > { %v1043_v21 = vpop.f32.mrf.mxu1 }
 0x2fa   : > { %v687_v22 = vadd.f32 %v1043_v21, %v1229_v1  ;;  %v1002_v23 = vmul.f32 -1.442695, %v1043_v21 }
 0x2fb   : > { %v671_v24 = vpop.f32.mrf.mxu1 }
 0x2fc   : > { %690 = vst.msk [vmem:[%s437_s12 + $0x10] sm:$0xff] %vm442_vm0, %v687_v22  ;;  %1105 = vpow2.f32 %v1002_v23  ;;  %v685_v25 = vadd.f32 %v671_v24, %v1227_v0  ;;  %v1000_v26 = vmul.f32 -1.442695, %v671_v24 }
 0x2fd   : > { %v1044_v27 = vpop.f32.mrf.mxu1 }
 0x2fe   : > { %688 = vst.msk [vmem:[%s437_s12] sm:$0xff] %vm442_vm0, %v685_v25  ;;  %1107 = vpow2.f32 %v1000_v26 }
 0x2ff   : > { %v674_v28 = vpop.f32.mrf.mxu1 }
 0x300   : > { %v686_v29 = vadd.f32 %v674_v28, %v1231_v2  ;;  %v1001_v30 = vmul.f32 -1.442695, %v674_v28 }
 0x302   : > { %689 = vst.msk [vmem:[%s437_s12 + $0x8] sm:$0xff] %vm442_vm0, %v686_v29  ;;  %1109 = vpow2.f32 %v1001_v30 }
 0x309   : > { %v1106_v1 = vpop.eup %1105 }
 0x30a   : > { %v702_v32 = vadd.f32 1.0, %v1106_v1 }
 0x30b   : > { %v1108_v31 = vpop.eup %1107 }
 0x30c   : > { %v700_v33 = vadd.f32 1.0, %v1108_v31  ;;  %1111 = vrcp.f32 %v702_v32 }
 0x30e   : > { %1113 = vrcp.f32 %v700_v33 }
 0x30f   : > { %v1110_v34 = vpop.eup %1109 }
 0x310   : > { %v701_v0 = vadd.f32 1.0, %v1110_v34 }
 0x312   : > { %1115 = vrcp.f32 %v701_v0 }
 0x319   : > { %v1112_v35 = vpop.eup %1111 }
 0x31a   : > { %v711_v38 = vmul.f32 %v1112_v35, %v1043_v21 }
 0x31b   : > { %v1114_v36 = vpop.eup %1113 }
 0x31c   : > { %v709_v39 = vmul.f32 %v1114_v36, %v671_v24  ;;  %v713_v41 = vpack.c.bf16 %v711_v38, %v711_v38 }
 0x31f   : > { %v1116_v37 = vpop.eup %1115 }
 0x320   : > { %v710_v40 = vmul.f32 %v1116_v37, %v674_v28 }
 0x322   : > { %v712_v2 = vpack.c.bf16 %v710_v40, %v709_v39 }
 0x324   : > { %1049 = vmatprep.mubr.msk.bf16.mxu0 %vm442_vm0, %v712_v2 }
 0x325   : > { %1050 = vmatmul.mubr.msk.bf16.vlgmr.msra.gmra.mxu0 %vm442_vm0, %v713_v41 }
 0x3e5   : > { %v1051_v42 = vpop.f32.mrf.mxu0 }
 0x3e6   : > { %v786_v47 = vmul.f32 %v1051_v42, %v1051_v42 }
 0x3e7   : > { %v770_v43 = vpop.f32.mrf.mxu0 }
 0x3e8   : > { %v784_v45 = vmul.f32 %v770_v43, %v770_v43  ;;  %v790_v53 = vsel %vm630_vm1, %v786_v47, 0.0 }
 0x3e9   : > { %v1052_v44 = vpop.f32.mrf.mxu0 }
 0x3ea   : > { %v787_v49 = vsel %vm630_vm1, %v784_v45, 0.0 }
 0x3eb   : > { %v773_v46 = vpop.f32.mrf.mxu0 }
 0x3ec   : > { %v785_v48 = vmul.f32 %v773_v46, %v773_v46 }
 0x3ee   : > { %v788_v50 = vsel %vm630_vm1, %v785_v48, 0.0 }
 0x3ef   : > { %v789_v51 = vadd.f32 %v788_v50, %v787_v49 }
 0x3f1   : > { %v791_v54 = vadd.f32 %v790_v53, %v789_v51 }
 0x3f3   : > { %1117 = vrsqrt.f32 %v791_v54  ;;  %vm794_vm2 = vcmp.eq.f32.partialorder %v791_v54, inf  ;;  %v797_v57 = vand.u32 2147483648, %v791_v54  ;;  %vm796_vm3 = vcmp.eq.f32.partialorder %v791_v54, 0.0 }
 0x3f4   : > { %1119 = vrsqrt.f32 %v810_v62 }
 0x400   : > { %v1118_v55 = vpop.eup %1117 }
 0x401   : > { %v793_v56 = vmul.f32 %v1118_v55, %v791_v54  ;;  %v1120_v63 = vpop.eup %1119 }
 0x402   : > { %v812_v3 = vmul.f32 %v1120_v63, %v1290_v18 }
 0x403   : > { %v795_v58 = vsel %vm794_vm2, %v791_v54, %v793_v56 }
 0x404   : > { %v798_v59 = vsel %vm796_vm3, %v797_v57, %v795_v58  ;;  %v820_v5 = vmul.f32 %v1007_v4, %v812_v3 }
 0x405   : > { %831 = vrot.lane.b32.xlu0 %v798_v59, %s1145_s17 }
 0x406   : > { %v828_v7 = vadd.f32 %v1008_v6, %v820_v5 }
 0x408   : > { %v829_v8 = vmul.f32 %v828_v7, %v798_v59 }
 0x477   : > { %v832_v9 = vpop.permute.xlu0 %831 }
 0x478   : > { %v834_v10 = vadd.f32 %v832_v9, %v829_v8 }
 0x47a   : > { %v835_v11 = vadd.f32 %v834_v10, %v1277_v52 }
 0x47c   : > { %836 = vst.msk [vmem:[%s429_s25] sm:$0xff] %vm442_vm0, %v835_v11 }
 0x47d PF: > { %s21_s15 = sadd.s32 1, %s1143_s15   ;;  %s1345_s13 = smov %s1139_s14 }
 0x47e   : > { %p18_p5 = scmp.ge.s32.totalorder %s21_s15, 4   ;;  %s1346_s14 = smov %s1348_s16 }
 0x480   :  { %20 = sbr.rel (!%p18_p5) target bundleno = 2 (0x2), region = 101 }

</bundles_post_ra>
